<compile_context>
chip_gen: v5e
topology: v5e:2x2
jax: 0.10.0
libtpu: 0.0.40
codegen_flags: <defaults>
</compile_context>

<pallas_src>
import jax
import jax.numpy as jnp
from jax import lax
from jax.experimental import pallas as pl
from jax.experimental.pallas import tpu as pltpu

LRELU_SLOPE = 0.01   # nn.LeakyReLU default
BN_EPS = 1e-5        # nn.BatchNorm2d default
K_PAD = 32           # conv im2col K = 3*3*3 = 27, zero-padded to 32


# ---------------- the single fused Pallas kernel ----------------

def _vae_kernel(patT_ref, w1T_ref, b1_ref, wml_ref, bml_ref, eps_ref,
                wd_ref, bd_ref, o_ref, h2_s):
    """Whole VAE forward (n=16, eval mode) in one kernel.

    patT : (32, B*64)  im2col input, rows (cin,kh,kw) zero-padded 27->32, cols (b,oh,ow)
    w1T  : (8, 32)     conv1 weight with BatchNorm folded, transposed
    b1   : (8, 1)      conv1 bias with BatchNorm folded
    wml  : (512, 400)  [mu_w | log_var_w]
    bml  : (1, 400)    [mu_b | log_var_b]
    eps  : (B, 200)    reparameterization noise
    wd   : (200, 768)  decoder Linear+ConvTranspose folded affine weight
    bd   : (1, 768)    folded affine bias
    out  : (B, 768)    sigmoid output, NCHW-flattened (B, 3, 16, 16)
    h2_s : (B, 512)    VMEM scratch for the NCHW flatten
    """
    # Encoder conv (+folded BN) + LeakyReLU; lane-dense (8, B*64) intermediate.
    hT = jnp.dot(w1T_ref[...], patT_ref[...],
                 preferred_element_type=jnp.float32) + b1_ref[...]      # (8, B*64)
    hT = jnp.where(hT >= 0.0, hT, LRELU_SLOPE * hT)
    # Dropout2d(p=0.25) is identity in eval mode.

    # NCHW flatten (view(-1, 512)): h2[b, c*64 + p] = hT[c, b*64 + p],
    # realised as 16 contiguous 64-lane copies through VMEM scratch.
    B = h2_s.shape[0]
    C, SP = 8, 64
    for b in range(B):
        for c in range(C):
            h2_s[b:b + 1, c * SP:(c + 1) * SP] = hT[c:c + 1, b * SP:(b + 1) * SP]
    h2 = h2_s[...]                                                      # (B, 512)

    # mu / log_var in one matmul + reparameterization trick.
    ml = jnp.dot(h2, wml_ref[...],
                 preferred_element_type=jnp.float32) + bml_ref[...]     # (B, 400)
    mu = ml[:, :200]
    lv = ml[:, 200:400]
    z = mu + jnp.exp(0.5 * lv) * eps_ref[...]                           # (B, 200)

    # Decoder: Linear(200,512) -> view(8,8,8) -> ConvTranspose2d(8,3,4,2,1)
    # folded at init into one affine map; then Sigmoid.  Lane-dense output.
    o_ref[...] = jax.nn.sigmoid(
        jnp.dot(z, wd_ref[...], preferred_element_type=jnp.float32) + bd_ref[...])


# ---------------- trace-time im2col (tiny XLA prep) ----------------

def _im2col_T(x, k, s, p):
    """NCHW x -> transposed patch matrix (C*k*k, B*OH*OW); row order
    (cin, kh, kw) (= PyTorch weight flatten), col order (b, oh, ow)."""
    B, C, H, W = x.shape
    xp = jnp.pad(x, ((0, 0), (0, 0), (p, p), (p, p)))
    OH = (H + 2 * p - k) // s + 1
    OW = (W + 2 * p - k) // s + 1
    taps = []
    for kh in range(k):
        for kw in range(k):
            taps.append(xp[:, :, kh:kh + s * (OH - 1) + 1:s,
                               kw:kw + s * (OW - 1) + 1:s])             # (B, C, OH, OW)
    pat = jnp.stack(taps, axis=2)                                       # (B, C, k*k, OH, OW)
    patT = pat.transpose(1, 2, 0, 3, 4).reshape(C * k * k, B * OH * OW)
    return patT, OH, OW


# ---------------- parameters: raw init + one-time folding ----------------

def init_raw_params(key):
    """Raw parameters matching the PyTorch module layout (n = 16 => x = 0)."""
    ks = jax.random.split(key, 10)

    def u(k_, shape, fan_in):
        bound = 1.0 / jnp.sqrt(jnp.float32(fan_in))
        return jax.random.uniform(k_, shape, jnp.float32, -bound, bound)

    p = {}
    # Encoder: Conv2d(3, 8, k=3, s=2, p=1) + BatchNorm2d(8) (eval running stats)
    p["conv1_w"] = u(ks[0], (8, 3, 3, 3), 3 * 3 * 3)
    p["conv1_b"] = u(ks[1], (8,), 3 * 3 * 3)
    p["bn1_gamma"] = jnp.ones((8,), jnp.float32)
    p["bn1_beta"] = jnp.zeros((8,), jnp.float32)
    p["bn1_rm"] = jnp.zeros((8,), jnp.float32)
    p["bn1_rv"] = jnp.ones((8,), jnp.float32)
    # Encoder heads: Linear(512, 200) x2, stored (in, out)
    p["mu_w"] = u(ks[2], (512, 200), 512)
    p["mu_b"] = u(ks[3], (200,), 512)
    p["lv_w"] = u(ks[4], (512, 200), 512)
    p["lv_b"] = u(ks[5], (200,), 512)
    # Decoder: Linear(200, 512); ConvTranspose2d(8, 3, 4, 2, 1) (PyTorch (in,out,kh,kw))
    p["dec_w"] = u(ks[6], (200, 512), 200)
    p["dec_b"] = u(ks[7], (512,), 200)
    p["deconv_w"] = u(ks[8], (8, 3, 4, 4), 8 * 4 * 4)
    p["deconv_b"] = u(ks[9], (3,), 8 * 4 * 4)
    return p


def _convT_nobias(v, w_pt, precision=None):
    """PyTorch ConvTranspose2d(k=4, s=2, p=1) without bias.
    v: (N, Cin, 8, 8) NCHW; w_pt: (Cin, Cout, 4, 4) PyTorch layout."""
    w_oihw = jnp.flip(w_pt, (2, 3)).transpose(1, 0, 2, 3)               # (Cout, Cin, 4, 4)
    return lax.conv_general_dilated(
        v, w_oihw, window_strides=(1, 1), padding=[(2, 2), (2, 2)],
        lhs_dilation=(2, 2), dimension_numbers=("NCHW", "OIHW", "NCHW"),
        precision=precision)


def fold_params(raw):
    """Fold eval-mode BN into conv1, merge mu/log_var, and collapse the decoder
    Linear+view+ConvTranspose into one (200, 768) affine map.  Runs once,
    eagerly, outside the hot path."""
    hi = lax.Precision.HIGHEST
    # Conv1 + BatchNorm (running stats) fold.
    scale = raw["bn1_gamma"] / jnp.sqrt(raw["bn1_rv"] + BN_EPS)          # (8,)
    w1 = raw["conv1_w"] * scale[:, None, None, None]                     # (8, 3, 3, 3)
    b1 = (raw["conv1_b"] - raw["bn1_rm"]) * scale + raw["bn1_beta"]      # (8,)
    w1T = jnp.pad(w1.reshape(8, 27), ((0, 0), (0, K_PAD - 27)))          # (8, 32)
    # Merge mu / log_var heads into one matmul.
    w_mulv = jnp.concatenate([raw["mu_w"], raw["lv_w"]], axis=1)         # (512, 400)
    b_mulv = jnp.concatenate([raw["mu_b"], raw["lv_b"]])[None, :]        # (1, 400)
    # Decoder affine fold: out_flat = z @ (dec_w @ A) + (dec_b @ A + bT_flat),
    # where A[i, :] is the ConvTranspose response to NCHW basis image i.
    eye = jnp.eye(512, dtype=jnp.float32).reshape(512, 8, 8, 8)
    A = _convT_nobias(eye, raw["deconv_w"], precision=hi).reshape(512, 768)
    w_dec = jnp.matmul(raw["dec_w"], A, precision=hi)                    # (200, 768)
    b_dec = (jnp.matmul(raw["dec_b"][None, :], A, precision=hi)[0]
             + jnp.repeat(raw["deconv_b"], 16 * 16))[None, :]            # (1, 768)
    return {"w1T": w1T, "b1": b1[:, None], "w_mulv": w_mulv, "b_mulv": b_mulv,
            "w_dec": w_dec, "b_dec": b_dec}


# ---------------- forward ----------------

def vae_forward(params, img, eps):
    B = img.shape[0]
    patT, OH, OW = _im2col_T(img, k=3, s=2, p=1)                         # (27, B*64)
    patT = jnp.pad(patT, ((0, K_PAD - patT.shape[0]), (0, 0)))           # (32, B*64)

    out_flat = pl.pallas_call(
        _vae_kernel,
        out_shape=jax.ShapeDtypeStruct((B, 3 * 16 * 16), jnp.float32),
        in_specs=[pl.BlockSpec(memory_space=pltpu.MemorySpace.VMEM) for _ in range(8)],
        out_specs=pl.BlockSpec(memory_space=pltpu.MemorySpace.VMEM),
        scratch_shapes=[pltpu.VMEM((B, 8 * OH * OW), jnp.float32)],
    )(patT, params["w1T"], params["b1"], params["w_mulv"], params["b_mulv"],
      eps, params["w_dec"], params["b_dec"])
    return out_flat.reshape(B, 3, 16, 16)


# ---------------- pure-JAX unfused reference (for a sanity check) ----------------

def vae_reference(raw, img, eps):
    B = img.shape[0]
    y = lax.conv_general_dilated(
        img, raw["conv1_w"], window_strides=(2, 2), padding=[(1, 1), (1, 1)],
        dimension_numbers=("NCHW", "OIHW", "NCHW"))
    y = y + raw["conv1_b"][None, :, None, None]
    scale = raw["bn1_gamma"] / jnp.sqrt(raw["bn1_rv"] + BN_EPS)
    y = (y - raw["bn1_rm"][None, :, None, None]) * scale[None, :, None, None] \
        + raw["bn1_beta"][None, :, None, None]
    y = jnp.where(y >= 0.0, y, LRELU_SLOPE * y)
    h = y.reshape(B, 512)
    mu = h @ raw["mu_w"] + raw["mu_b"]
    lv = h @ raw["lv_w"] + raw["lv_b"]
    z = mu + jnp.exp(0.5 * lv) * eps
    v = (z @ raw["dec_w"] + raw["dec_b"]).reshape(B, 8, 8, 8)
    out = _convT_nobias(v, raw["deconv_w"]) + raw["deconv_b"][None, :, None, None]
    return jax.nn.sigmoid(out)


if __name__ == "__main__":
    key = jax.random.PRNGKey(0)
    k_params, k_img, k_eps = jax.random.split(key, 3)

    raw = init_raw_params(k_params)
    params = fold_params(raw)                 # one-time folding, outside the hot path

    B, n = 2, 16
    img = jax.random.normal(k_img, (B, 3, n, n), jnp.float32)   # NCHW like PyTorch
    eps = jax.random.normal(k_eps, (B, 200), jnp.float32)       # reparameterization noise

    out = jax.block_until_ready(jax.jit(vae_forward)(params, img, eps))
    assert out.shape == (B, 3, n, n), out.shape
    assert out.dtype == jnp.float32
    assert bool(jnp.all(jnp.isfinite(out)))
    assert bool(jnp.all((out >= 0.0) & (out <= 1.0)))           # sigmoid range

    # sanity check the fused/folded kernel against the unfused pure-JAX forward
    ref = jax.block_until_ready(vae_reference(raw, img, eps))
    max_err = float(jnp.max(jnp.abs(out - ref)))
    assert max_err < 2e-2, max_err

    print("KERNEL_OK")
</pallas_src>

<mosaic_0001>
module attributes {stable_mosaic.version = 11 : i64} {
  func.func @_vae_kernel(%arg0: memref<32x128xf32, #tpu.memory_space<vmem>>, %arg1: memref<8x32xf32, #tpu.memory_space<vmem>>, %arg2: memref<8x1xf32, #tpu.memory_space<vmem>>, %arg3: memref<512x400xf32, #tpu.memory_space<vmem>>, %arg4: memref<1x400xf32, #tpu.memory_space<vmem>>, %arg5: memref<2x200xf32, #tpu.memory_space<vmem>>, %arg6: memref<200x768xf32, #tpu.memory_space<vmem>>, %arg7: memref<1x768xf32, #tpu.memory_space<vmem>>, %arg8: memref<2x768xf32, #tpu.memory_space<vmem>>, %arg9: memref<2x512xf32, #tpu.memory_space<vmem>>) attributes {dimension_semantics = [], scalar_prefetch = 0 : i64, scratch_operands = 1 : i64, tpu.core_type = #tpu.core_type<tc>} {
    %c0 = arith.constant 0 : index
    %c0_0 = arith.constant 0 : index
    %0 = vector.load %arg1[%c0, %c0_0] : memref<8x32xf32, #tpu.memory_space<vmem>>, vector<8x32xf32>
    %c0_1 = arith.constant 0 : index
    %c0_2 = arith.constant 0 : index
    %1 = vector.load %arg0[%c0_1, %c0_2] : memref<32x128xf32, #tpu.memory_space<vmem>>, vector<32x128xf32>
    %cst = arith.constant dense<0.000000e+00> : vector<8x128xf32>
    %2 = tpu.matmul %0, %1, %cst {dimension_numbers = #tpu.dot_dimension_numbers<[1], [0], [0], [1], [0, 0, 1, 1], [], []>} : vector<8x32xf32>, vector<32x128xf32>, vector<8x128xf32> -> vector<8x128xf32>
    %c0_3 = arith.constant 0 : index
    %c0_4 = arith.constant 0 : index
    %3 = vector.load %arg2[%c0_3, %c0_4] : memref<8x1xf32, #tpu.memory_space<vmem>>, vector<8x1xf32>
    %4 = vector.broadcast %3 : vector<8x1xf32> to vector<8x128xf32>
    %5 = arith.addf %2, %4 : vector<8x128xf32>
    %cst_5 = arith.constant 0.000000e+00 : f32
    %6 = vector.broadcast %cst_5 : f32 to vector<8x128xf32>
    %7 = arith.cmpf oge, %5, %6 : vector<8x128xf32>
    %cst_6 = arith.constant 0.00999999977 : f32
    %8 = vector.broadcast %cst_6 : f32 to vector<8x128xf32>
    %9 = arith.mulf %8, %5 : vector<8x128xf32>
    %10 = arith.select %7, %5, %9 : vector<8x128xi1>, vector<8x128xf32>
    %11 = vector.extract_strided_slice %10 {offsets = [0, 0], sizes = [1, 64], strides = [1, 1]} : vector<8x128xf32> to vector<1x64xf32>
    %c0_7 = arith.constant 0 : index
    %c0_8 = arith.constant 0 : index
    %12 = vector.load %arg9[%c0_7, %c0_8] : memref<2x512xf32, #tpu.memory_space<vmem>>, vector<1x64xf32>
    tpu.vector_store %arg9[%c0_7, %c0_8], %11 {strides = array<i32>} : memref<2x512xf32, #tpu.memory_space<vmem>>, vector<1x64xf32>,
    %13 = vector.extract_strided_slice %10 {offsets = [1, 0], sizes = [1, 64], strides = [1, 1]} : vector<8x128xf32> to vector<1x64xf32>
    %c0_9 = arith.constant 0 : index
    %c64 = arith.constant 64 : index
    %14 = vector.load %arg9[%c0_9, %c64] : memref<2x512xf32, #tpu.memory_space<vmem>>, vector<1x64xf32>
    tpu.vector_store %arg9[%c0_9, %c64], %13 {strides = array<i32>} : memref<2x512xf32, #tpu.memory_space<vmem>>, vector<1x64xf32>,
    %15 = vector.extract_strided_slice %10 {offsets = [2, 0], sizes = [1, 64], strides = [1, 1]} : vector<8x128xf32> to vector<1x64xf32>
    %c0_10 = arith.constant 0 : index
    %c128 = arith.constant 128 : index
    %16 = vector.load %arg9[%c0_10, %c128] : memref<2x512xf32, #tpu.memory_space<vmem>>, vector<1x64xf32>
    tpu.vector_store %arg9[%c0_10, %c128], %15 {strides = array<i32>} : memref<2x512xf32, #tpu.memory_space<vmem>>, vector<1x64xf32>,
    %17 = vector.extract_strided_slice %10 {offsets = [3, 0], sizes = [1, 64], strides = [1, 1]} : vector<8x128xf32> to vector<1x64xf32>
    %c0_11 = arith.constant 0 : index
    %c192 = arith.constant 192 : index
    %18 = vector.load %arg9[%c0_11, %c192] : memref<2x512xf32, #tpu.memory_space<vmem>>, vector<1x64xf32>
    tpu.vector_store %arg9[%c0_11, %c192], %17 {strides = array<i32>} : memref<2x512xf32, #tpu.memory_space<vmem>>, vector<1x64xf32>,
    %19 = vector.extract_strided_slice %10 {offsets = [4, 0], sizes = [1, 64], strides = [1, 1]} : vector<8x128xf32> to vector<1x64xf32>
    %c0_12 = arith.constant 0 : index
    %c256 = arith.constant 256 : index
    %20 = vector.load %arg9[%c0_12, %c256] : memref<2x512xf32, #tpu.memory_space<vmem>>, vector<1x64xf32>
    tpu.vector_store %arg9[%c0_12, %c256], %19 {strides = array<i32>} : memref<2x512xf32, #tpu.memory_space<vmem>>, vector<1x64xf32>,
    %21 = vector.extract_strided_slice %10 {offsets = [5, 0], sizes = [1, 64], strides = [1, 1]} : vector<8x128xf32> to vector<1x64xf32>
    %c0_13 = arith.constant 0 : index
    %c320 = arith.constant 320 : index
    %22 = vector.load %arg9[%c0_13, %c320] : memref<2x512xf32, #tpu.memory_space<vmem>>, vector<1x64xf32>
    tpu.vector_store %arg9[%c0_13, %c320], %21 {strides = array<i32>} : memref<2x512xf32, #tpu.memory_space<vmem>>, vector<1x64xf32>,
    %23 = vector.extract_strided_slice %10 {offsets = [6, 0], sizes = [1, 64], strides = [1, 1]} : vector<8x128xf32> to vector<1x64xf32>
    %c0_14 = arith.constant 0 : index
    %c384 = arith.constant 384 : index
    %24 = vector.load %arg9[%c0_14, %c384] : memref<2x512xf32, #tpu.memory_space<vmem>>, vector<1x64xf32>
    tpu.vector_store %arg9[%c0_14, %c384], %23 {strides = array<i32>} : memref<2x512xf32, #tpu.memory_space<vmem>>, vector<1x64xf32>,
    %25 = vector.extract_strided_slice %10 {offsets = [7, 0], sizes = [1, 64], strides = [1, 1]} : vector<8x128xf32> to vector<1x64xf32>
    %c0_15 = arith.constant 0 : index
    %c448 = arith.constant 448 : index
    %26 = vector.load %arg9[%c0_15, %c448] : memref<2x512xf32, #tpu.memory_space<vmem>>, vector<1x64xf32>
    tpu.vector_store %arg9[%c0_15, %c448], %25 {strides = array<i32>} : memref<2x512xf32, #tpu.memory_space<vmem>>, vector<1x64xf32>,
    %27 = vector.extract_strided_slice %10 {offsets = [0, 64], sizes = [1, 64], strides = [1, 1]} : vector<8x128xf32> to vector<1x64xf32>
    %c1 = arith.constant 1 : index
    %c0_16 = arith.constant 0 : index
    %28 = vector.load %arg9[%c1, %c0_16] : memref<2x512xf32, #tpu.memory_space<vmem>>, vector<1x64xf32>
    tpu.vector_store %arg9[%c1, %c0_16], %27 {strides = array<i32>} : memref<2x512xf32, #tpu.memory_space<vmem>>, vector<1x64xf32>,
    %29 = vector.extract_strided_slice %10 {offsets = [1, 64], sizes = [1, 64], strides = [1, 1]} : vector<8x128xf32> to vector<1x64xf32>
    %c1_17 = arith.constant 1 : index
    %c64_18 = arith.constant 64 : index
    %30 = vector.load %arg9[%c1_17, %c64_18] : memref<2x512xf32, #tpu.memory_space<vmem>>, vector<1x64xf32>
    tpu.vector_store %arg9[%c1_17, %c64_18], %29 {strides = array<i32>} : memref<2x512xf32, #tpu.memory_space<vmem>>, vector<1x64xf32>,
    %31 = vector.extract_strided_slice %10 {offsets = [2, 64], sizes = [1, 64], strides = [1, 1]} : vector<8x128xf32> to vector<1x64xf32>
    %c1_19 = arith.constant 1 : index
    %c128_20 = arith.constant 128 : index
    %32 = vector.load %arg9[%c1_19, %c128_20] : memref<2x512xf32, #tpu.memory_space<vmem>>, vector<1x64xf32>
    tpu.vector_store %arg9[%c1_19, %c128_20], %31 {strides = array<i32>} : memref<2x512xf32, #tpu.memory_space<vmem>>, vector<1x64xf32>,
    %33 = vector.extract_strided_slice %10 {offsets = [3, 64], sizes = [1, 64], strides = [1, 1]} : vector<8x128xf32> to vector<1x64xf32>
    %c1_21 = arith.constant 1 : index
    %c192_22 = arith.constant 192 : index
    %34 = vector.load %arg9[%c1_21, %c192_22] : memref<2x512xf32, #tpu.memory_space<vmem>>, vector<1x64xf32>
    tpu.vector_store %arg9[%c1_21, %c192_22], %33 {strides = array<i32>} : memref<2x512xf32, #tpu.memory_space<vmem>>, vector<1x64xf32>,
    %35 = vector.extract_strided_slice %10 {offsets = [4, 64], sizes = [1, 64], strides = [1, 1]} : vector<8x128xf32> to vector<1x64xf32>
    %c1_23 = arith.constant 1 : index
    %c256_24 = arith.constant 256 : index
    %36 = vector.load %arg9[%c1_23, %c256_24] : memref<2x512xf32, #tpu.memory_space<vmem>>, vector<1x64xf32>
    tpu.vector_store %arg9[%c1_23, %c256_24], %35 {strides = array<i32>} : memref<2x512xf32, #tpu.memory_space<vmem>>, vector<1x64xf32>,
    %37 = vector.extract_strided_slice %10 {offsets = [5, 64], sizes = [1, 64], strides = [1, 1]} : vector<8x128xf32> to vector<1x64xf32>
    %c1_25 = arith.constant 1 : index
    %c320_26 = arith.constant 320 : index
    %38 = vector.load %arg9[%c1_25, %c320_26] : memref<2x512xf32, #tpu.memory_space<vmem>>, vector<1x64xf32>
    tpu.vector_store %arg9[%c1_25, %c320_26], %37 {strides = array<i32>} : memref<2x512xf32, #tpu.memory_space<vmem>>, vector<1x64xf32>,
    %39 = vector.extract_strided_slice %10 {offsets = [6, 64], sizes = [1, 64], strides = [1, 1]} : vector<8x128xf32> to vector<1x64xf32>
    %c1_27 = arith.constant 1 : index
    %c384_28 = arith.constant 384 : index
    %40 = vector.load %arg9[%c1_27, %c384_28] : memref<2x512xf32, #tpu.memory_space<vmem>>, vector<1x64xf32>
    tpu.vector_store %arg9[%c1_27, %c384_28], %39 {strides = array<i32>} : memref<2x512xf32, #tpu.memory_space<vmem>>, vector<1x64xf32>,
    %41 = vector.extract_strided_slice %10 {offsets = [7, 64], sizes = [1, 64], strides = [1, 1]} : vector<8x128xf32> to vector<1x64xf32>
    %c1_29 = arith.constant 1 : index
    %c448_30 = arith.constant 448 : index
    %42 = vector.load %arg9[%c1_29, %c448_30] : memref<2x512xf32, #tpu.memory_space<vmem>>, vector<1x64xf32>
    tpu.vector_store %arg9[%c1_29, %c448_30], %41 {strides = array<i32>} : memref<2x512xf32, #tpu.memory_space<vmem>>, vector<1x64xf32>,
    %c0_31 = arith.constant 0 : index
    %c0_32 = arith.constant 0 : index
    %43 = vector.load %arg9[%c0_31, %c0_32] : memref<2x512xf32, #tpu.memory_space<vmem>>, vector<2x512xf32>
    %c0_33 = arith.constant 0 : index
    %c0_34 = arith.constant 0 : index
    %44 = vector.load %arg3[%c0_33, %c0_34] : memref<512x400xf32, #tpu.memory_space<vmem>>, vector<512x400xf32>
    %cst_35 = arith.constant dense<0.000000e+00> : vector<2x400xf32>
    %45 = tpu.matmul %43, %44, %cst_35 {dimension_numbers = #tpu.dot_dimension_numbers<[1], [0], [0], [1], [0, 0, 1, 1], [], []>} : vector<2x512xf32>, vector<512x400xf32>, vector<2x400xf32> -> vector<2x400xf32>
    %c0_36 = arith.constant 0 : index
    %c0_37 = arith.constant 0 : index
    %46 = vector.load %arg4[%c0_36, %c0_37] : memref<1x400xf32, #tpu.memory_space<vmem>>, vector<1x400xf32>
    %47 = vector.broadcast %46 : vector<1x400xf32> to vector<2x400xf32>
    %48 = arith.addf %45, %47 : vector<2x400xf32>
    %49 = vector.extract_strided_slice %48 {offsets = [0, 0], sizes = [2, 200], strides = [1, 1]} : vector<2x400xf32> to vector<2x200xf32>
    %50 = vector.extract_strided_slice %48 {offsets = [0, 200], sizes = [2, 200], strides = [1, 1]} : vector<2x400xf32> to vector<2x200xf32>
    %cst_38 = arith.constant 5.000000e-01 : f32
    %51 = vector.broadcast %cst_38 : f32 to vector<2x200xf32>
    %52 = arith.mulf %51, %50 : vector<2x200xf32>
    %53 = math.exp %52 : vector<2x200xf32>
    %c0_39 = arith.constant 0 : index
    %c0_40 = arith.constant 0 : index
    %54 = vector.load %arg5[%c0_39, %c0_40] : memref<2x200xf32, #tpu.memory_space<vmem>>, vector<2x200xf32>
    %55 = arith.mulf %53, %54 : vector<2x200xf32>
    %56 = arith.addf %49, %55 : vector<2x200xf32>
    %c0_41 = arith.constant 0 : index
    %c0_42 = arith.constant 0 : index
    %57 = vector.load %arg6[%c0_41, %c0_42] : memref<200x768xf32, #tpu.memory_space<vmem>>, vector<200x768xf32>
    %cst_43 = arith.constant dense<0.000000e+00> : vector<2x768xf32>
    %58 = tpu.matmul %56, %57, %cst_43 {dimension_numbers = #tpu.dot_dimension_numbers<[1], [0], [0], [1], [0, 0, 1, 1], [], []>} : vector<2x200xf32>, vector<200x768xf32>, vector<2x768xf32> -> vector<2x768xf32>
    %c0_44 = arith.constant 0 : index
    %c0_45 = arith.constant 0 : index
    %59 = vector.load %arg7[%c0_44, %c0_45] : memref<1x768xf32, #tpu.memory_space<vmem>>, vector<1x768xf32>
    %60 = vector.broadcast %59 : vector<1x768xf32> to vector<2x768xf32>
    %61 = arith.addf %58, %60 : vector<2x768xf32>
    %62 = arith.negf %61 : vector<2x768xf32>
    %63 = math.exp %62 : vector<2x768xf32>
    %cst_46 = arith.constant 1.000000e+00 : f32
    %64 = vector.broadcast %cst_46 : f32 to vector<2x768xf32>
    %65 = arith.addf %64, %63 : vector<2x768xf32>
    %66 = arith.divf %64, %65 : vector<2x768xf32>
    %c0_47 = arith.constant 0 : index
    %c0_48 = arith.constant 0 : index
    %67 = vector.load %arg8[%c0_47, %c0_48] : memref<2x768xf32, #tpu.memory_space<vmem>>, vector<2x768xf32>
    tpu.vector_store %arg8[%c0_47, %c0_48], %66 {strides = array<i32>} : memref<2x768xf32, #tpu.memory_space<vmem>>, vector<2x768xf32>,
    return
  }
}

</mosaic_0001>

<bundles_post_ra>
// kernel: vae_forward.1
= control target key start
LH: loop header
LB: loop body
LE: loop exit
PB: predicated region body
PF: predicated region fallthrough
CT: control target
= control target key end

     0   :  { %v1406_v2 = vmov 0   ;;  %vm40_vm0 = vcmask 261120   ;;  %vm67_vm2 = vcmask 516096   ;;  %vm75_vm3 = vcmask 1040896   ;;  %s2875_s0 = inlined_call_operand.vmem [shape: f32[32,128], index: 0, kind: input, shape index: {}]   ;;  %s2876_s2 = inlined_call_operand.vmem [shape: f32[8,1], index: 2, kind: input, shape index: {}]   ;;  %s2877_s1 = inlined_call_operand.vmem [shape: f32[8,32], index: 1, kind: input, shape index: {}]   ;;  %s2878_s3 = inlined_call_operand.vmem [shape: f32[512,400], index: 3, kind: input, shape index: {}]   ;;  %s2879_s5 = inlined_call_operand.vmem [shape: f32[2,200], index: 5, kind: input, shape index: {}]   ;;  %s2880_s4 = inlined_call_operand.vmem [shape: f32[1,400], index: 4, kind: input, shape index: {}]   ;;  %s2881_s6 = inlined_call_operand.vmem [shape: f32[200,768], index: 6, kind: input, shape index: {}]   ;;  %s2882_s7 = inlined_call_operand.vmem [shape: f32[1,768], index: 7, kind: input, shape index: {}]   ;;  %s2883_s8 = inlined_call_operand.vmem [shape: f32[2,768], index: 8, kind: output, shape index: {}]  }
   0x1   :  { %v33_v0 = vld [vmem:[%s2875_s0 + $0x18] sm:$0xff]  ;;  %v32_v1 = vld [vmem:[%s2875_s0 + $0x10] sm:$0xff]  ;;  %1375 = vset.pattern.permute.xlu0 %v1406_v2  ;;  %v34_v3 = vld [vmem:[%s2876_s2] sm:$0xff]  ;;  %s1407_s2 = smov 64   ;;  %vm782_vm4 = vcmask 588800   ;;  %vm799_vm5 = vcmask 457728  }
   0x2   :  { %56 = vmatpush.msra.mxu0 %v33_v0  ;;  %v31_v4 = vld [vmem:[%s2875_s0 + $0x8] sm:$0xff]  ;;  %37 = vperm.xlu0 %1375, %v34_v3   ;;  %v30_v5 = vld [vmem:[%s2875_s0] sm:$0xff]  ;;  %s1408_s0 = smov 72   ;;  %vm1337_vm10 = vcmask 1041408  }
   0x3   :  { %v29_v6 = vld [vmem:[%s2877_s1] sm:$0xff] }
   0x4   :  { %57 = vmatpush.msra.mxu0 %v32_v1  ;;  %v228_v29 = vld [vmem:[%s2878_s3 + $0x1e0] sm:$0xff] }
   0x5   :  { %v292_v30 = vld [vmem:[%s2878_s3 + $0x3e0] sm:$0xff]  ;;  %444 = vmatpush.msra.mxu1 %v228_v29 }
   0x6   :  { %58 = vmatpush.msra.mxu0 %v31_v4  ;;  %v356_v31 = vld [vmem:[%s2878_s3 + $0x5e0] sm:$0xff]  ;;  %464 = vmatpush.msra.mxu2 %v292_v30 }
   0x7   :  { %v420_v32 = vld [vmem:[%s2878_s3 + $0x7e0] sm:$0xff]  ;;  %484 = vmatpush.msra.mxu3 %v356_v31 }
   0x8   :  { %59 = vmatpush.msra.mxu0 %v30_v5  ;;  %v224_v33 = vld [vmem:[%s2878_s3 + $0x1c0] sm:$0xff] }
   0x9   :  { %1352 = vmatmul.msk.f32.vlgmr.msra.gmra.mxu0 %vm40_vm0, %v29_v6  ;;  %v288_v34 = vld [vmem:[%s2878_s3 + $0x3c0] sm:$0xff]  ;;  %445 = vmatpush.msra.mxu1 %v224_v33  ;;  %v229_v33 = vld [vmem:[%s2878_s3 + $0x1e8] sm:$0xff] }
   0xa   :  { %504 = vmatpush.msrb.mxu0 %v420_v32  ;;  %v352_v35 = vld [vmem:[%s2878_s3 + $0x5c0] sm:$0xff]  ;;  %465 = vmatpush.msra.mxu2 %v288_v34  ;;  %v293_v34 = vld [vmem:[%s2878_s3 + $0x3e8] sm:$0xff] }
   0xb   :  { %v416_v36 = vld [vmem:[%s2878_s3 + $0x7c0] sm:$0xff]  ;;  %485 = vmatpush.msra.mxu3 %v352_v35  ;;  %v357_v35 = vld [vmem:[%s2878_s3 + $0x5e8] sm:$0xff] }
   0xc   :  { %v220_v37 = vld [vmem:[%s2878_s3 + $0x1a0] sm:$0xff]  ;;  %505 = vmatpush.msrb.mxu0 %v416_v36  ;;  %v421_v36 = vld [vmem:[%s2878_s3 + $0x7e8] sm:$0xff] }
   0xd   :  { %v284_v38 = vld [vmem:[%s2878_s3 + $0x3a0] sm:$0xff]  ;;  %446 = vmatpush.msra.mxu1 %v220_v37  ;;  %v225_v37 = vld [vmem:[%s2878_s3 + $0x1c8] sm:$0xff] }
   0xe   :  { %v348_v39 = vld [vmem:[%s2878_s3 + $0x5a0] sm:$0xff]  ;;  %466 = vmatpush.msra.mxu2 %v284_v38  ;;  %v289_v38 = vld [vmem:[%s2878_s3 + $0x3c8] sm:$0xff] }
   0xf   :  { %v412_v40 = vld [vmem:[%s2878_s3 + $0x7a0] sm:$0xff]  ;;  %486 = vmatpush.msra.mxu3 %v348_v39  ;;  %v353_v39 = vld [vmem:[%s2878_s3 + $0x5c8] sm:$0xff] }
  0x10   :  { %v216_v41 = vld [vmem:[%s2878_s3 + $0x180] sm:$0xff]  ;;  %506 = vmatpush.msrb.mxu0 %v412_v40  ;;  %v417_v40 = vld [vmem:[%s2878_s3 + $0x7c8] sm:$0xff] }
  0x11   :  { %v280_v42 = vld [vmem:[%s2878_s3 + $0x380] sm:$0xff]  ;;  %447 = vmatpush.msra.mxu1 %v216_v41  ;;  %v221_v41 = vld [vmem:[%s2878_s3 + $0x1a8] sm:$0xff] }
  0x12   :  { %v344_v43 = vld [vmem:[%s2878_s3 + $0x580] sm:$0xff]  ;;  %467 = vmatpush.msra.mxu2 %v280_v42  ;;  %v285_v42 = vld [vmem:[%s2878_s3 + $0x3a8] sm:$0xff] }
  0x13   :  { %v408_v44 = vld [vmem:[%s2878_s3 + $0x780] sm:$0xff]  ;;  %487 = vmatpush.msra.mxu3 %v344_v43  ;;  %v349_v43 = vld [vmem:[%s2878_s3 + $0x5a8] sm:$0xff] }
  0x14   :  { %v212_v45 = vld [vmem:[%s2878_s3 + $0x160] sm:$0xff]  ;;  %507 = vmatpush.msrb.mxu0 %v408_v44  ;;  %v413_v44 = vld [vmem:[%s2878_s3 + $0x7a8] sm:$0xff] }
  0x15   :  { %v276_v46 = vld [vmem:[%s2878_s3 + $0x360] sm:$0xff]  ;;  %448 = vmatpush.msra.mxu1 %v212_v45  ;;  %v217_v45 = vld [vmem:[%s2878_s3 + $0x188] sm:$0xff] }
  0x16   :  { %v340_v47 = vld [vmem:[%s2878_s3 + $0x560] sm:$0xff]  ;;  %468 = vmatpush.msra.mxu2 %v276_v46  ;;  %v281_v46 = vld [vmem:[%s2878_s3 + $0x388] sm:$0xff] }
  0x17   :  { %v404_v48 = vld [vmem:[%s2878_s3 + $0x760] sm:$0xff]  ;;  %488 = vmatpush.msra.mxu3 %v340_v47  ;;  %v345_v47 = vld [vmem:[%s2878_s3 + $0x588] sm:$0xff] }
  0x18   :  { %v208_v49 = vld [vmem:[%s2878_s3 + $0x140] sm:$0xff]  ;;  %508 = vmatpush.msrb.mxu0 %v404_v48  ;;  %v409_v48 = vld [vmem:[%s2878_s3 + $0x788] sm:$0xff] }
  0x19   :  { %v272_v50 = vld [vmem:[%s2878_s3 + $0x340] sm:$0xff]  ;;  %449 = vmatpush.msra.mxu1 %v208_v49  ;;  %v213_v49 = vld [vmem:[%s2878_s3 + $0x168] sm:$0xff] }
  0x1a   :  { %v336_v51 = vld [vmem:[%s2878_s3 + $0x540] sm:$0xff]  ;;  %469 = vmatpush.msra.mxu2 %v272_v50  ;;  %v277_v50 = vld [vmem:[%s2878_s3 + $0x368] sm:$0xff] }
  0x1b   :  { %v400_v52 = vld [vmem:[%s2878_s3 + $0x740] sm:$0xff]  ;;  %489 = vmatpush.msra.mxu3 %v336_v51  ;;  %v341_v51 = vld [vmem:[%s2878_s3 + $0x568] sm:$0xff] }
  0x1c   :  { %v204_v53 = vld [vmem:[%s2878_s3 + $0x120] sm:$0xff]  ;;  %509 = vmatpush.msrb.mxu0 %v400_v52  ;;  %v405_v52 = vld [vmem:[%s2878_s3 + $0x768] sm:$0xff] }
  0x1d   :  { %v268_v54 = vld [vmem:[%s2878_s3 + $0x320] sm:$0xff]  ;;  %450 = vmatpush.msra.mxu1 %v204_v53  ;;  %v209_v53 = vld [vmem:[%s2878_s3 + $0x148] sm:$0xff] }
  0x1e   :  { %v332_v55 = vld [vmem:[%s2878_s3 + $0x520] sm:$0xff]  ;;  %470 = vmatpush.msra.mxu2 %v268_v54  ;;  %v273_v54 = vld [vmem:[%s2878_s3 + $0x348] sm:$0xff] }
  0x1f   :  { %v396_v56 = vld [vmem:[%s2878_s3 + $0x720] sm:$0xff]  ;;  %490 = vmatpush.msra.mxu3 %v332_v55  ;;  %v337_v55 = vld [vmem:[%s2878_s3 + $0x548] sm:$0xff] }
  0x20   :  { %v200_v57 = vld [vmem:[%s2878_s3 + $0x100] sm:$0xff]  ;;  %510 = vmatpush.msrb.mxu0 %v396_v56  ;;  %v401_v56 = vld [vmem:[%s2878_s3 + $0x748] sm:$0xff] }
  0x21   :  { %v264_v58 = vld [vmem:[%s2878_s3 + $0x300] sm:$0xff]  ;;  %451 = vmatpush.msra.mxu1 %v200_v57  ;;  %v205_v57 = vld [vmem:[%s2878_s3 + $0x128] sm:$0xff] }
  0x22   :  { %v328_v60 = vld [vmem:[%s2878_s3 + $0x500] sm:$0xff]  ;;  %471 = vmatpush.msra.mxu2 %v264_v58  ;;  %v269_v58 = vld [vmem:[%s2878_s3 + $0x328] sm:$0xff] }
  0x23   :  { %v392_v61 = vld [vmem:[%s2878_s3 + $0x700] sm:$0xff]  ;;  %491 = vmatpush.msra.mxu3 %v328_v60  ;;  %v397_v60 = vld [vmem:[%s2878_s3 + $0x728] sm:$0xff] }
  0x24   :  { %v196_v62 = vld [vmem:[%s2878_s3 + $0xe0] sm:$0xff]  ;;  %511 = vmatpush.msrb.mxu0 %v392_v61  ;;  %v201_v61 = vld [vmem:[%s2878_s3 + $0x108] sm:$0xff] }
  0x25   :  { %v260_v63 = vld [vmem:[%s2878_s3 + $0x2e0] sm:$0xff]  ;;  %452 = vmatpush.msra.mxu1 %v196_v62  ;;  %v265_v62 = vld [vmem:[%s2878_s3 + $0x308] sm:$0xff] }
  0x26   :  { %v324_v0 = vld [vmem:[%s2878_s3 + $0x4e0] sm:$0xff]  ;;  %472 = vmatpush.msra.mxu2 %v260_v63  ;;  %v329_v63 = vld [vmem:[%s2878_s3 + $0x508] sm:$0xff] }
  0x27   :  { %v388_v1 = vld [vmem:[%s2878_s3 + $0x6e0] sm:$0xff]  ;;  %492 = vmatpush.msra.mxu3 %v324_v0  ;;  %v393_v0 = vld [vmem:[%s2878_s3 + $0x708] sm:$0xff] }
  0x28   :  { %v192_v2 = vld [vmem:[%s2878_s3 + $0xc0] sm:$0xff]  ;;  %512 = vmatpush.msrb.mxu0 %v388_v1  ;;  %v197_v1 = vld [vmem:[%s2878_s3 + $0xe8] sm:$0xff] }
  0x29   :  { %v256_v3 = vld [vmem:[%s2878_s3 + $0x2c0] sm:$0xff]  ;;  %453 = vmatpush.msra.mxu1 %v192_v2  ;;  %v261_v2 = vld [vmem:[%s2878_s3 + $0x2e8] sm:$0xff] }
  0x2a   :  { %v320_v4 = vld [vmem:[%s2878_s3 + $0x4c0] sm:$0xff]  ;;  %473 = vmatpush.msra.mxu2 %v256_v3  ;;  %v325_v3 = vld [vmem:[%s2878_s3 + $0x4e8] sm:$0xff] }
  0x2b   :  { %v384_v5 = vld [vmem:[%s2878_s3 + $0x6c0] sm:$0xff]  ;;  %493 = vmatpush.msra.mxu3 %v320_v4  ;;  %v389_v4 = vld [vmem:[%s2878_s3 + $0x6e8] sm:$0xff] }
  0x2c   :  { %v188_v6 = vld [vmem:[%s2878_s3 + $0xa0] sm:$0xff]  ;;  %513 = vmatpush.msrb.mxu0 %v384_v5  ;;  %v193_v5 = vld [vmem:[%s2878_s3 + $0xc8] sm:$0xff] }
  0x2d   :  { %454 = vmatpush.msra.mxu1 %v188_v6  ;;  %v168_v29 = vld [vmem:[%s2878_s3] sm:$0xff]  ;;  %v257_v6 = vld [vmem:[%s2878_s3 + $0x2c8] sm:$0xff] }
  0x2e   :  { %v232_v30 = vld [vmem:[%s2878_s3 + $0x200] sm:$0xff] }
  0x2f   :  { %v296_v31 = vld [vmem:[%s2878_s3 + $0x400] sm:$0xff] }
  0x30   :  { %v360_v32 = vld [vmem:[%s2878_s3 + $0x600] sm:$0xff] }
  0x74   :  { %v38_v7 = vpop.permute.xlu0 %37 }
  0x86   :  { %v61_v8 = vpop.f32.mrf.mxu0 }
  0x87   :  { %v62_v9 = vadd.f32 %v61_v8, %v38_v7  ;;  %v252_v7 = vld [vmem:[%s2878_s3 + $0x2a0] sm:$0xff] }
  0x88   :  { %v316_v8 = vld [vmem:[%s2878_s3 + $0x4a0] sm:$0xff]  ;;  %474 = vmatpush.msra.mxu2 %v252_v7  ;;  %v321_v7 = vld [vmem:[%s2878_s3 + $0x4c8] sm:$0xff] }
  0x89   :  { %vm64_vm1 = vcmp.ge.f32.partialorder %v62_v9, 0.0  ;;  %v65_v10 = vmul.f32 0.01, %v62_v9  ;;  %494 = vmatpush.msra.mxu3 %v316_v8  ;;  %v385_v8 = vld [vmem:[%s2878_s3 + $0x6c8] sm:$0xff] }
  0x8b   :  { %v66_v11 = vsel %vm64_vm1, %v62_v9, %v65_v10  ;;  %v380_v9 = vld [vmem:[%s2878_s3 + $0x6a0] sm:$0xff] }
  0x8c   :  { %77 = vst.sshfl [vmem:[#allocation1] sm:$0xff pattern:$0x73625140] %v66_v11  ;;  %119 = vrot.lane.b32.xlu0 %v66_v11, %s1407_s2  ;;  %v70_v12 = vrot.slane %v66_v11, 7  ;;  %514 = vmatpush.msrb.mxu0 %v380_v9  ;;  %v189_v9 = vld [vmem:[%s2878_s3 + $0xa8] sm:$0xff] }
  0x8d   :  { %68 = vst.msk [vmem:[#allocation2] sm:$0x1] %vm67_vm2, %v66_v11 }
  0x8e   :  { %v1475_v13 = vrot.slane %v70_v12, 2  ;;  %v248_v12 = vld [vmem:[%s2878_s3 + $0x280] sm:$0xff] }
  0x8f   :  { %475 = vmatpush.msra.mxu2 %v248_v12 }
  0x90   :  { %72 = vrot.lane.b32.xlu2 %v1475_v13, %s1407_s2 }
  0x93   :  { %v79_v14 = vld [vmem:[#allocation1 + $0x1] ss:$4 sm:$0xff] }
  0x94   :  { %82 = vst.sshfl [vmem:[#allocation1] sm:$0xff pattern:$0x73625140] %v66_v11 }
  0x95   :  { %81 = vst.msk [vmem:[#allocation2 + $0x2] sm:$0x1] %vm67_vm2, %v79_v14  ;;  %v376_v14 = vld [vmem:[%s2878_s3 + $0x680] sm:$0xff] }
  0x96   :  { %515 = vmatpush.msrb.mxu0 %v376_v14  ;;  %v381_v14 = vld [vmem:[%s2878_s3 + $0x6a8] sm:$0xff] }
  0x9b   :  { %v84_v15 = vld [vmem:[#allocation1 + $0x1] ss:$4 sm:$0xff] }
  0x9c   :  { %v1353_v16 = vrot.slane %v84_v15, 9  ;;  %91 = vst.sshfl [vmem:[#allocation1] sm:$0xff pattern:$0x73625140] %v66_v11  ;;  %v180_v15 = vld [vmem:[%s2878_s3 + $0x60] sm:$0xff] }
  0x9e   :  { %87 = vrot.lane.b32.xlu0 %v1353_v16, %s1407_s2  ;;  %v244_v16 = vld [vmem:[%s2878_s3 + $0x260] sm:$0xff] }
  0x9f   :  { %476 = vmatpush.msra.mxu2 %v244_v16  ;;  %v249_v16 = vld [vmem:[%s2878_s3 + $0x288] sm:$0xff] }
  0xa3   :  { %v93_v17 = vld [vmem:[#allocation1 + $0x2] ss:$4 sm:$0xff] }
  0xa4   :  { %96 = vst.sshfl [vmem:[#allocation1] sm:$0xff pattern:$0x73625140] %v66_v11 }
  0xa5   :  { %95 = vst.msk [vmem:[#allocation2 + $0x4] sm:$0x1] %vm67_vm2, %v93_v17  ;;  %v308_v17 = vld [vmem:[%s2878_s3 + $0x460] sm:$0xff] }
  0xab   :  { %v98_v18 = vld [vmem:[#allocation1 + $0x2] ss:$4 sm:$0xff] }
  0xac   :  { %105 = vst.sshfl [vmem:[#allocation1] sm:$0xff pattern:$0x73625140] %v66_v11  ;;  %v1354_v24 = vrot.slane %v98_v18, 9  ;;  %v372_v18 = vld [vmem:[%s2878_s3 + $0x660] sm:$0xff] }
  0xad   :  { %516 = vmatpush.msrb.mxu0 %v372_v18  ;;  %v181_v18 = vld [vmem:[%s2878_s3 + $0x68] sm:$0xff] }
  0xb3   :  { %v107_v19 = vld [vmem:[#allocation1 + $0x3] ss:$4 sm:$0xff] }
  0xb4   :  { %110 = vst.sshfl [vmem:[#allocation1] sm:$0xff pattern:$0x73625140] %v66_v11 }
  0xb5   :  { %109 = vst.msk [vmem:[#allocation2 + $0x6] sm:$0x1] %vm67_vm2, %v107_v19  ;;  %v176_v19 = vld [vmem:[%s2878_s3 + $0x40] sm:$0xff] }
  0xbb   :  { %v112_v20 = vld [vmem:[#allocation1 + $0x3] ss:$4 sm:$0xff] }
  0xbc   :  { %125 = vst.sshfl [vmem:[#allocation1] sm:$0xff pattern:$0x73625140] %v66_v11  ;;  %v1355_v28 = vrot.slane %v112_v20, 9  ;;  %v240_v20 = vld [vmem:[%s2878_s3 + $0x240] sm:$0xff] }
  0xbd   :  { %477 = vmatpush.msra.mxu2 %v240_v20  ;;  %v309_v20 = vld [vmem:[%s2878_s3 + $0x468] sm:$0xff] }
  0xc3   :  { %v127_v21 = vld [vmem:[#allocation1 + $0x1] ss:$4 sm:$0xff] }
  0xc4   :  { %128 = vrot.lane.b32.xlu1 %v127_v21, %s1407_s2  ;;  %132 = vst.sshfl [vmem:[#allocation1] sm:$0xff pattern:$0x73625140] %v66_v11  ;;  %v304_v21 = vld [vmem:[%s2878_s3 + $0x440] sm:$0xff] }
  0xcb   :  { %v1484_v22 = vld [vmem:[#allocation1 + $0x1] ss:$4 sm:$0xff] }
  0xcc   :  { %139 = vst.sshfl [vmem:[#allocation1] sm:$0xff pattern:$0x73625140] %v66_v11 }
  0xd3   :  { %v141_v23 = vld [vmem:[#allocation1 + $0x2] ss:$4 sm:$0xff] }
  0xd4   :  { %142 = vrot.lane.b32.xlu1 %v141_v23, %s1407_s2  ;;  %146 = vst.sshfl [vmem:[#allocation1] sm:$0xff pattern:$0x73625140] %v66_v11  ;;  %v368_v23 = vld [vmem:[%s2878_s3 + $0x640] sm:$0xff] }
  0xd5   :  { %517 = vmatpush.msrb.mxu0 %v368_v23  ;;  %v177_v23 = vld [vmem:[%s2878_s3 + $0x48] sm:$0xff] }
  0xdb   :  { %v1487_v25 = vld [vmem:[#allocation1 + $0x2] ss:$4 sm:$0xff] }
  0xdc   :  { %153 = vst.sshfl [vmem:[#allocation1] sm:$0xff pattern:$0x73625140] %v66_v11  ;;  %101 = vrot.lane.b32.xlu1 %v1354_v24, %s1407_s2  ;;  %v172_v24 = vld [vmem:[%s2878_s3 + $0x20] sm:$0xff] }
  0xe3   :  { %v155_v26 = vld [vmem:[#allocation1 + $0x3] ss:$4 sm:$0xff] }
  0xe4   :  { %156 = vrot.lane.b32.xlu2 %v155_v26, %s1407_s2  ;;  %160 = vst.sshfl [vmem:[#allocation1] sm:$0xff pattern:$0x73625140] %v66_v11  ;;  %v184_v11 = vld [vmem:[%s2878_s3 + $0x80] sm:$0xff] }
  0xe5   :  { %455 = vmatpush.msra.mxu1 %v184_v11  ;;  %v236_v26 = vld [vmem:[%s2878_s3 + $0x220] sm:$0xff]  ;;  %v317_v11 = vld [vmem:[%s2878_s3 + $0x4a8] sm:$0xff] }
  0xe6   :  { %478 = vmatpush.msra.mxu2 %v236_v26  ;;  %v305_v26 = vld [vmem:[%s2878_s3 + $0x448] sm:$0xff] }
  0xe7   :  { %456 = vmatpush.msra.mxu1 %v180_v15  ;;  %v185_v15 = vld [vmem:[%s2878_s3 + $0x88] sm:$0xff] }
  0xe8   :  { %479 = vmatpush.msra.mxu2 %v232_v30  ;;  %v237_v30 = vld [vmem:[%s2878_s3 + $0x228] sm:$0xff] }
  0xe9   :  { %457 = vmatpush.msra.mxu1 %v176_v19  ;;  %v245_v19 = vld [vmem:[%s2878_s3 + $0x268] sm:$0xff] }
  0xea   :  { %v73_v27 = vpop.permute.xlu2 %72  ;;  %544 = vmatpush.msrb.mxu2 %v293_v34  ;;  %v233_v34 = vld [vmem:[%s2878_s3 + $0x208] sm:$0xff] }
  0xeb   :  { %76 = vst.msk [vmem:[#allocation2] sm:$0x1] %vm75_vm3, %v73_v27  ;;  %v300_v27 = vld [vmem:[%s2878_s3 + $0x420] sm:$0xff]  ;;  %458 = vmatpush.msra.mxu1 %v172_v24  ;;  %v241_v24 = vld [vmem:[%s2878_s3 + $0x248] sm:$0xff] }
  0xec   :  { %115 = vrot.lane.b32.xlu2 %v1355_v28, %s1407_s2  ;;  %v364_v28 = vld [vmem:[%s2878_s3 + $0x620] sm:$0xff]  ;;  %545 = vmatpush.msrb.mxu2 %v289_v38  ;;  %v361_v38 = vld [vmem:[%s2878_s3 + $0x608] sm:$0xff] }
  0xed   :  { %518 = vmatpush.msrb.mxu0 %v364_v28  ;;  %459 = vmatpush.msra.mxu1 %v168_v29  ;;  %v162_v28 = vld [vmem:[#allocation1 + $0x3] ss:$4 sm:$0xff] }
  0xee   :  { %546 = vmatpush.msrb.mxu2 %v285_v42  ;;  %v173_v29 = vld [vmem:[%s2878_s3 + $0x28] sm:$0xff] }
  0xef   :  { %519 = vmatpush.msrb.mxu0 %v360_v32  ;;  %524 = vmatpush.msrb.mxu1 %v229_v33  ;;  %v365_v32 = vld [vmem:[%s2878_s3 + $0x628] sm:$0xff] }
  0xf0   :  { %547 = vmatpush.msrb.mxu2 %v281_v46  ;;  %v169_v33 = vld [vmem:[%s2878_s3 + $0x8] sm:$0xff]  ;;  %v358_v46 = vld [vmem:[%s2878_s3 + $0x5f0] sm:$0xff] }
  0xf1   :  { %584 = vmatpush.msra.mxu0 %v421_v36  ;;  %525 = vmatpush.msrb.mxu1 %v225_v37  ;;  %v297_v37 = vld [vmem:[%s2878_s3 + $0x408] sm:$0xff] }
  0xf2   :  { %548 = vmatpush.msrb.mxu2 %v277_v50 }
  0xf3   :  { %585 = vmatpush.msra.mxu0 %v417_v40  ;;  %526 = vmatpush.msrb.mxu1 %v221_v41  ;;  %v1357_v40 = vrot.slane %v1487_v25, 9  ;;  %v230_v25 = vld [vmem:[%s2878_s3 + $0x1f0] sm:$0xff] }
  0xf4   :  { %549 = vmatpush.msrb.mxu2 %v273_v54  ;;  %v354_v54 = vld [vmem:[%s2878_s3 + $0x5d0] sm:$0xff] }
  0xf5   :  { %586 = vmatpush.msra.mxu0 %v413_v44  ;;  %527 = vmatpush.msrb.mxu1 %v217_v45  ;;  %v773_v44 = vld [vmem:[%s2879_s5] sm:$0xf]  ;;  %v294_v45 = vld [vmem:[%s2878_s3 + $0x3f0] sm:$0xff] }
  0xf6   :  { %550 = vmatpush.msrb.mxu2 %v269_v58  ;;  %v350_v58 = vld [vmem:[%s2878_s3 + $0x5b0] sm:$0xff] }
  0xf7   :  { %587 = vmatpush.msra.mxu0 %v409_v48  ;;  %528 = vmatpush.msrb.mxu1 %v213_v49 }
  0xf8   :  { %551 = vmatpush.msrb.mxu2 %v265_v62  ;;  %v346_v62 = vld [vmem:[%s2878_s3 + $0x590] sm:$0xff] }
  0xf9   :  { %588 = vmatpush.msra.mxu0 %v405_v52  ;;  %529 = vmatpush.msrb.mxu1 %v209_v53  ;;  %v226_v52 = vld [vmem:[%s2878_s3 + $0x1d0] sm:$0xff] }
  0xfa   :  { %552 = vmatpush.msrb.mxu2 %v261_v2  ;;  %v290_v53 = vld [vmem:[%s2878_s3 + $0x3d0] sm:$0xff] }
  0xfb   :  { %589 = vmatpush.msra.mxu0 %v401_v56  ;;  %530 = vmatpush.msrb.mxu1 %v205_v57  ;;  %v222_v56 = vld [vmem:[%s2878_s3 + $0x1b0] sm:$0xff] }
  0xfc   :  { %553 = vmatpush.msrb.mxu2 %v257_v6  ;;  %v286_v57 = vld [vmem:[%s2878_s3 + $0x3b0] sm:$0xff] }
  0xfd   :  { %590 = vmatpush.msra.mxu0 %v397_v60  ;;  %531 = vmatpush.msrb.mxu1 %v201_v61  ;;  %v218_v60 = vld [vmem:[%s2878_s3 + $0x190] sm:$0xff] }
  0xfe   :  { %v120_v59 = vpop.permute.xlu0 %119  ;;  %v282_v61 = vld [vmem:[%s2878_s3 + $0x390] sm:$0xff] }
  0xff   :  { %122 = vst.msk [vmem:[#allocation2 + $0x1] sm:$0x1] %vm67_vm2, %v120_v59  ;;  %v333_v59 = vld [vmem:[%s2878_s3 + $0x528] sm:$0xff]  ;;  %591 = vmatpush.msra.mxu0 %v393_v0  ;;  %532 = vmatpush.msrb.mxu1 %v197_v1  ;;  %v278_v0 = vld [vmem:[%s2878_s3 + $0x370] sm:$0xff] }
 0x100   :  { %124 = vst.msk [vmem:[#allocation2 + $0x1] sm:$0x1] %vm75_vm3, %v1475_v13  ;;  %v312_v13 = vld [vmem:[%s2878_s3 + $0x480] sm:$0xff]  ;;  %v342_v1 = vld [vmem:[%s2878_s3 + $0x570] sm:$0xff] }
 0x101   :  { %495 = vmatpush.msra.mxu3 %v312_v13  ;;  %592 = vmatpush.msra.mxu0 %v389_v4  ;;  %v1356_v13 = vrot.slane %v1484_v22, 9  ;;  %v313_v22 = vld [vmem:[%s2878_s3 + $0x488] sm:$0xff]  ;;  %v406_v2 = vld [vmem:[%s2878_s3 + $0x770] sm:$0xff] }
 0x102   :  { %533 = vmatpush.msrb.mxu1 %v193_v5  ;;  %v274_v5 = vld [vmem:[%s2878_s3 + $0x350] sm:$0xff] }
 0x103   :  { %496 = vmatpush.msra.mxu3 %v308_v17  ;;  %593 = vmatpush.msra.mxu0 %v385_v8  ;;  %v377_v17 = vld [vmem:[%s2878_s3 + $0x688] sm:$0xff]  ;;  %v214_v6 = vld [vmem:[%s2878_s3 + $0x170] sm:$0xff] }
 0x104   :  { %534 = vmatpush.msrb.mxu1 %v189_v9  ;;  %v402_v8 = vld [vmem:[%s2878_s3 + $0x750] sm:$0xff] }
 0x105   :  { %497 = vmatpush.msra.mxu3 %v304_v21  ;;  %594 = vmatpush.msra.mxu0 %v381_v14  ;;  %v373_v21 = vld [vmem:[%s2878_s3 + $0x668] sm:$0xff]  ;;  %v270_v9 = vld [vmem:[%s2878_s3 + $0x330] sm:$0xff] }
 0x106   :  { %535 = vmatpush.msrb.mxu1 %v185_v15  ;;  %v206_v14 = vld [vmem:[%s2878_s3 + $0x130] sm:$0xff] }
 0x107   :  { %498 = vmatpush.msra.mxu3 %v300_v27  ;;  %595 = vmatpush.msra.mxu0 %v377_v17  ;;  %v369_v27 = vld [vmem:[%s2878_s3 + $0x648] sm:$0xff]  ;;  %v330_v15 = vld [vmem:[%s2878_s3 + $0x510] sm:$0xff] }
 0x108   :  { %536 = vmatpush.msrb.mxu1 %v181_v18  ;;  %v202_v17 = vld [vmem:[%s2878_s3 + $0x110] sm:$0xff] }
 0x109   :  { %499 = vmatpush.msra.mxu3 %v296_v31  ;;  %596 = vmatpush.msra.mxu0 %v373_v21  ;;  %v301_v31 = vld [vmem:[%s2878_s3 + $0x428] sm:$0xff]  ;;  %v326_v18 = vld [vmem:[%s2878_s3 + $0x4f0] sm:$0xff] }
 0x10a   :  { %537 = vmatpush.msrb.mxu1 %v177_v23  ;;  %v198_v21 = vld [vmem:[%s2878_s3 + $0xf0] sm:$0xff] }
 0x10b   :  { %564 = vmatpush.msrb.mxu3 %v357_v35  ;;  %597 = vmatpush.msra.mxu0 %v369_v27  ;;  %v1358_v35 = vrot.slane %v162_v28, 9  ;;  %v322_v23 = vld [vmem:[%s2878_s3 + $0x4d0] sm:$0xff] }
 0x10c   :  { %538 = vmatpush.msrb.mxu1 %v173_v29  ;;  %v194_v27 = vld [vmem:[%s2878_s3 + $0xd0] sm:$0xff] }
 0x10d   :  { %565 = vmatpush.msrb.mxu3 %v353_v39  ;;  %598 = vmatpush.msra.mxu0 %v365_v32  ;;  %v318_v28 = vld [vmem:[%s2878_s3 + $0x4b0] sm:$0xff] }
 0x10e   :  { %539 = vmatpush.msrb.mxu1 %v169_v33  ;;  %v382_v29 = vld [vmem:[%s2878_s3 + $0x6b0] sm:$0xff] }
 0x10f   :  { %566 = vmatpush.msrb.mxu3 %v349_v43  ;;  %599 = vmatpush.msra.mxu0 %v361_v38  ;;  %v314_v32 = vld [vmem:[%s2878_s3 + $0x490] sm:$0xff] }
 0x110   :  { %v88_v10 = vpop.permute.xlu0 %87  ;;  %v378_v33 = vld [vmem:[%s2878_s3 + $0x690] sm:$0xff] }
 0x111   :  { %90 = vst.msk [vmem:[#allocation2 + $0x2] sm:$0x1] %vm75_vm3, %v88_v10  ;;  %567 = vmatpush.msrb.mxu3 %v345_v47  ;;  %v253_v10 = vld [vmem:[%s2878_s3 + $0x2a8] sm:$0xff]  ;;  %v422_v47 = vld [vmem:[%s2878_s3 + $0x7f0] sm:$0xff] }
 0x112   :  { %554 = vmatpush.msrb.mxu2 %v253_v10  ;;  %v210_v10 = vld [vmem:[%s2878_s3 + $0x150] sm:$0xff] }
 0x113   :  { %568 = vmatpush.msrb.mxu3 %v341_v51  ;;  %v242_v38 = vld [vmem:[%s2878_s3 + $0x250] sm:$0xff] }
 0x114   :  { %555 = vmatpush.msrb.mxu2 %v249_v16  ;;  %v394_v16 = vld [vmem:[%s2878_s3 + $0x710] sm:$0xff] }
 0x115   :  { %569 = vmatpush.msrb.mxu3 %v337_v55  ;;  %v418_v55 = vld [vmem:[%s2878_s3 + $0x7d0] sm:$0xff] }
 0x116   :  { %556 = vmatpush.msrb.mxu2 %v245_v19  ;;  %v390_v19 = vld [vmem:[%s2878_s3 + $0x6f0] sm:$0xff] }
 0x117   :  { %570 = vmatpush.msrb.mxu3 %v333_v59  ;;  %v414_v59 = vld [vmem:[%s2878_s3 + $0x7b0] sm:$0xff] }
 0x118   :  { %557 = vmatpush.msrb.mxu2 %v241_v24  ;;  %v386_v24 = vld [vmem:[%s2878_s3 + $0x6d0] sm:$0xff] }
 0x119   :  { %571 = vmatpush.msrb.mxu3 %v329_v63  ;;  %v410_v63 = vld [vmem:[%s2878_s3 + $0x790] sm:$0xff] }
 0x11a   :  { %558 = vmatpush.msrb.mxu2 %v237_v30  ;;  %v250_v30 = vld [vmem:[%s2878_s3 + $0x290] sm:$0xff] }
 0x11b   :  { %572 = vmatpush.msrb.mxu3 %v325_v3 }
 0x11c   :  { %559 = vmatpush.msrb.mxu2 %v233_v34  ;;  %v246_v34 = vld [vmem:[%s2878_s3 + $0x270] sm:$0xff] }
 0x11d   :  { %573 = vmatpush.msrb.mxu3 %v321_v7  ;;  %v338_v7 = vld [vmem:[%s2878_s3 + $0x550] sm:$0xff] }
 0x11f   :  { %574 = vmatpush.msrb.mxu3 %v317_v11  ;;  %v334_v11 = vld [vmem:[%s2878_s3 + $0x530] sm:$0xff] }
 0x121   :  { %575 = vmatpush.msrb.mxu3 %v313_v22  ;;  %v262_v22 = vld [vmem:[%s2878_s3 + $0x2f0] sm:$0xff] }
 0x123   :  { %576 = vmatpush.msrb.mxu3 %v309_v20  ;;  %v258_v20 = vld [vmem:[%s2878_s3 + $0x2d0] sm:$0xff] }
 0x125   :  { %577 = vmatpush.msrb.mxu3 %v305_v26  ;;  %v254_v26 = vld [vmem:[%s2878_s3 + $0x2b0] sm:$0xff] }
 0x127   :  { %578 = vmatpush.msrb.mxu3 %v301_v31  ;;  %v190_v31 = vld [vmem:[%s2878_s3 + $0xb0] sm:$0xff] }
 0x129   :  { %579 = vmatpush.msrb.mxu3 %v297_v37  ;;  %v374_v37 = vld [vmem:[%s2878_s3 + $0x670] sm:$0xff] }
 0x136   :  { %v129_v12 = vpop.permute.xlu1 %128 }
 0x137   :  { %131 = vst.msk [vmem:[#allocation2 + $0x3] sm:$0x1] %vm67_vm2, %v129_v12  ;;  %v398_v12 = vld [vmem:[%s2878_s3 + $0x730] sm:$0xff] }
 0x138   :  { %138 = vst.msk [vmem:[#allocation2 + $0x3] sm:$0x1] %vm75_vm3, %v1356_v13  ;;  %v266_v13 = vld [vmem:[%s2878_s3 + $0x310] sm:$0xff] }
 0x13e   :  { %v157_v36 = vpop.permute.xlu2 %156 }
 0x13f   :  { %159 = vst.msk [vmem:[#allocation2 + $0x7] sm:$0x1] %vm67_vm2, %v157_v36  ;;  %v310_v36 = vld [vmem:[%s2878_s3 + $0x470] sm:$0xff] }
 0x140   :  { %166 = vst.msk [vmem:[#allocation2 + $0x7] sm:$0x1] %vm75_vm3, %v1358_v35  ;;  %v186_v35 = vld [vmem:[%s2878_s3 + $0x90] sm:$0xff] }
 0x146   :  { %v143_v39 = vpop.permute.xlu1 %142  ;;  %v116_v41 = vpop.permute.xlu2 %115 }
 0x147   :  { %145 = vst.msk [vmem:[#allocation2 + $0x5] sm:$0x1] %vm67_vm2, %v143_v39  ;;  %v182_v39 = vld [vmem:[%s2878_s3 + $0x70] sm:$0xff] }
 0x148   :  { %152 = vst.msk [vmem:[#allocation2 + $0x5] sm:$0x1] %vm75_vm3, %v1357_v40  ;;  %v306_v40 = vld [vmem:[%s2878_s3 + $0x450] sm:$0xff] }
 0x149   :  { %118 = vst.msk [vmem:[#allocation2 + $0x6] sm:$0x1] %vm75_vm3, %v116_v41  ;;  %v370_v41 = vld [vmem:[%s2878_s3 + $0x650] sm:$0xff] }
 0x14e   :  { %v102_v42 = vpop.permute.xlu1 %101 }
 0x14f   :  { %104 = vst.msk [vmem:[#allocation2 + $0x4] sm:$0x1] %vm75_vm3, %v102_v42  ;;  %v238_v42 = vld [vmem:[%s2878_s3 + $0x230] sm:$0xff] }
 0x156   :  { %v167_v43 = vld [vmem:[#allocation2] sm:$0xff] }
 0x157   :  { %435 = vst [vmem:[#allocation1] ss:$4 sm:$0xff] %v167_v43  ;;  %v178_v43 = vld [vmem:[%s2878_s3 + $0x50] sm:$0xff] }
 0x15e   :  { %v1906_v48 = vld.sshfl [vmem:[#allocation1] sm:$0xff pattern:$0x73625140]  ;;  %v1908_v49 = vld.sshfl [vmem:[#allocation1 + $0x8] sm:$0xff pattern:$0x73625140] }
 0x15f   :  { %460 = vmatmul.f32.vlgmr.msra.gmra.mxu1 %v1906_v48  ;;  %480 = vmatmul.f32.vlgmr.msra.gmra.mxu2 %v1908_v49  ;;  %v1912_v50 = vld.sshfl [vmem:[#allocation1 + $0x10] sm:$0xff pattern:$0x73625140]  ;;  %v1914_v51 = vld.sshfl [vmem:[#allocation1 + $0x18] sm:$0xff pattern:$0x73625140] }
 0x160   :  { %500 = vmatmul.f32.vlgmr.msra.gmra.mxu3 %v1912_v50  ;;  %520 = vmatmul.f32.vlgmr.msrb.gmra.mxu0 %v1914_v51  ;;  %775 = vst [vmem:[#allocation1] ss:$4 sm:$0xff] %v773_v44  ;;  %v302_v44 = vld [vmem:[%s2878_s3 + $0x430] sm:$0xff] }
 0x161   :  { %604 = vmatpush.msra.mxu1 %v230_v25  ;;  %624 = vmatpush.msra.mxu2 %v294_v45  ;;  %v366_v25 = vld [vmem:[%s2878_s3 + $0x630] sm:$0xff] }
 0x162   :  { %644 = vmatpush.msra.mxu3 %v358_v46  ;;  %664 = vmatpush.msrb.mxu0 %v422_v47  ;;  %v234_v45 = vld [vmem:[%s2878_s3 + $0x210] sm:$0xff] }
 0x163   :  { %605 = vmatpush.msra.mxu1 %v226_v52  ;;  %625 = vmatpush.msra.mxu2 %v290_v53  ;;  %v174_v46 = vld [vmem:[%s2878_s3 + $0x30] sm:$0xff] }
 0x164   :  { %645 = vmatpush.msra.mxu3 %v354_v54  ;;  %665 = vmatpush.msrb.mxu0 %v418_v55  ;;  %v298_v47 = vld [vmem:[%s2878_s3 + $0x410] sm:$0xff]  ;;  %v231_v54 = vld [vmem:[%s2878_s3 + $0x1f8] sm:$0xff] }
 0x165   :  { %606 = vmatpush.msra.mxu1 %v222_v56  ;;  %626 = vmatpush.msra.mxu2 %v286_v57  ;;  %v362_v52 = vld [vmem:[%s2878_s3 + $0x610] sm:$0xff]  ;;  %v295_v55 = vld [vmem:[%s2878_s3 + $0x3f8] sm:$0xff] }
 0x166   :  { %646 = vmatpush.msra.mxu3 %v350_v58  ;;  %666 = vmatpush.msrb.mxu0 %v414_v59  ;;  %v170_v53 = vld [vmem:[%s2878_s3 + $0x10] sm:$0xff]  ;;  %v359_v56 = vld [vmem:[%s2878_s3 + $0x5f8] sm:$0xff] }
 0x167   :  { %607 = vmatpush.msra.mxu1 %v218_v60  ;;  %627 = vmatpush.msra.mxu2 %v282_v61  ;;  %v777_v3 = vld.sshfl [vmem:[#allocation1 + $0x8] sm:$0xff pattern:$0x73625140]  ;;  %v776_v4 = vld.sshfl [vmem:[#allocation1] sm:$0xff pattern:$0x73625140] }
 0x168   :  { %647 = vmatpush.msra.mxu3 %v346_v62  ;;  %667 = vmatpush.msrb.mxu0 %v410_v63  ;;  %v423_v57 = vld [vmem:[%s2878_s3 + $0x7f8] sm:$0xff] }
 0x169   :  { %560 = vmatmul.f32.vlgmr.msrb.gmra.mxu2 %v1908_v49  ;;  %580 = vmatmul.f32.vlgmr.msrb.gmra.mxu3 %v1912_v50  ;;  %v227_v58 = vld [vmem:[%s2878_s3 + $0x1d8] sm:$0xff] }
 0x16a   :  { %600 = vmatmul.f32.vlgmr.msra.gmra.mxu0 %v1914_v51  ;;  %628 = vmatpush.msra.mxu2 %v278_v0  ;;  %v291_v59 = vld [vmem:[%s2878_s3 + $0x3d8] sm:$0xff] }
 0x16b   :  { %648 = vmatpush.msra.mxu3 %v342_v1  ;;  %668 = vmatpush.msrb.mxu0 %v406_v2  ;;  %v355_v60 = vld [vmem:[%s2878_s3 + $0x5d8] sm:$0xff] }
 0x16c   :  { %780 = vrot.lane.b32.xlu1 %v777_v3, %s1408_s0  ;;  %778 = vrot.lane.b32.xlu0 %v776_v4, %s1408_s0  ;;  %v419_v61 = vld [vmem:[%s2878_s3 + $0x7d8] sm:$0xff] }
 0x16d   :  { %540 = vmatmul.f32.vlgmr.msrb.gmra.mxu1 %v1906_v48  ;;  %629 = vmatpush.msra.mxu2 %v274_v5  ;;  %v223_v62 = vld [vmem:[%s2878_s3 + $0x1b8] sm:$0xff] }
 0x16e   :  { %608 = vmatpush.msra.mxu1 %v214_v6  ;;  %649 = vmatpush.msra.mxu3 %v338_v7  ;;  %v287_v63 = vld [vmem:[%s2878_s3 + $0x3b8] sm:$0xff] }
 0x16f   :  { %669 = vmatpush.msrb.mxu0 %v402_v8  ;;  %630 = vmatpush.msra.mxu2 %v270_v9  ;;  %v351_v0 = vld [vmem:[%s2878_s3 + $0x5b8] sm:$0xff] }
 0x170   :  { %609 = vmatpush.msra.mxu1 %v210_v10  ;;  %650 = vmatpush.msra.mxu3 %v334_v11  ;;  %v415_v1 = vld [vmem:[%s2878_s3 + $0x7b8] sm:$0xff] }
 0x171   :  { %670 = vmatpush.msrb.mxu0 %v398_v12  ;;  %631 = vmatpush.msra.mxu2 %v266_v13  ;;  %v219_v2 = vld [vmem:[%s2878_s3 + $0x198] sm:$0xff] }
 0x172   :  { %610 = vmatpush.msra.mxu1 %v206_v14  ;;  %651 = vmatpush.msra.mxu3 %v330_v15  ;;  %v283_v3 = vld [vmem:[%s2878_s3 + $0x398] sm:$0xff] }
 0x173   :  { %671 = vmatpush.msrb.mxu0 %v394_v16  ;;  %632 = vmatpush.msra.mxu2 %v262_v22  ;;  %v347_v4 = vld [vmem:[%s2878_s3 + $0x598] sm:$0xff] }
 0x174   :  { %611 = vmatpush.msra.mxu1 %v202_v17  ;;  %652 = vmatpush.msra.mxu3 %v326_v18  ;;  %v411_v5 = vld [vmem:[%s2878_s3 + $0x798] sm:$0xff] }
 0x175   :  { %672 = vmatpush.msrb.mxu0 %v390_v19  ;;  %633 = vmatpush.msra.mxu2 %v258_v20  ;;  %v215_v6 = vld [vmem:[%s2878_s3 + $0x178] sm:$0xff] }
 0x176   :  { %612 = vmatpush.msra.mxu1 %v198_v21  ;;  %653 = vmatpush.msra.mxu3 %v322_v23  ;;  %v279_v7 = vld [vmem:[%s2878_s3 + $0x378] sm:$0xff] }
 0x177   :  { %673 = vmatpush.msrb.mxu0 %v386_v24  ;;  %634 = vmatpush.msra.mxu2 %v254_v26  ;;  %v343_v8 = vld [vmem:[%s2878_s3 + $0x578] sm:$0xff] }
 0x178   :  { %613 = vmatpush.msra.mxu1 %v194_v27  ;;  %654 = vmatpush.msra.mxu3 %v318_v28  ;;  %v407_v9 = vld [vmem:[%s2878_s3 + $0x778] sm:$0xff] }
 0x179   :  { %674 = vmatpush.msrb.mxu0 %v382_v29  ;;  %635 = vmatpush.msra.mxu2 %v250_v30  ;;  %v211_v10 = vld [vmem:[%s2878_s3 + $0x158] sm:$0xff] }
 0x17a   :  { %614 = vmatpush.msra.mxu1 %v190_v31  ;;  %655 = vmatpush.msra.mxu3 %v314_v32  ;;  %v275_v11 = vld [vmem:[%s2878_s3 + $0x358] sm:$0xff] }
 0x17b   :  { %675 = vmatpush.msrb.mxu0 %v378_v33  ;;  %636 = vmatpush.msra.mxu2 %v246_v34  ;;  %v339_v12 = vld [vmem:[%s2878_s3 + $0x558] sm:$0xff] }
 0x17c   :  { %615 = vmatpush.msra.mxu1 %v186_v35  ;;  %656 = vmatpush.msra.mxu3 %v310_v36  ;;  %v403_v13 = vld [vmem:[%s2878_s3 + $0x758] sm:$0xff] }
 0x17d   :  { %676 = vmatpush.msrb.mxu0 %v374_v37  ;;  %637 = vmatpush.msra.mxu2 %v242_v38  ;;  %v207_v14 = vld [vmem:[%s2878_s3 + $0x138] sm:$0xff] }
 0x17e   :  { %616 = vmatpush.msra.mxu1 %v182_v39  ;;  %657 = vmatpush.msra.mxu3 %v306_v40  ;;  %v271_v15 = vld [vmem:[%s2878_s3 + $0x338] sm:$0xff] }
 0x17f   :  { %677 = vmatpush.msrb.mxu0 %v370_v41  ;;  %638 = vmatpush.msra.mxu2 %v238_v42  ;;  %v335_v16 = vld [vmem:[%s2878_s3 + $0x538] sm:$0xff] }
 0x180   :  { %617 = vmatpush.msra.mxu1 %v178_v43  ;;  %658 = vmatpush.msra.mxu3 %v302_v44  ;;  %v399_v22 = vld [vmem:[%s2878_s3 + $0x738] sm:$0xff] }
 0x181   :  { %678 = vmatpush.msrb.mxu0 %v366_v25  ;;  %639 = vmatpush.msra.mxu2 %v234_v45  ;;  %v203_v17 = vld [vmem:[%s2878_s3 + $0x118] sm:$0xff] }
 0x182   :  { %618 = vmatpush.msra.mxu1 %v174_v46  ;;  %659 = vmatpush.msra.mxu3 %v298_v47  ;;  %v267_v18 = vld [vmem:[%s2878_s3 + $0x318] sm:$0xff] }
 0x183   :  { %679 = vmatpush.msrb.mxu0 %v362_v52  ;;  %640 = vmatmul.f32.vlgmr.msra.gmra.mxu2 %v1908_v49  ;;  %v331_v19 = vld [vmem:[%s2878_s3 + $0x518] sm:$0xff] }
 0x184   :  { %619 = vmatpush.msra.mxu1 %v170_v53  ;;  %660 = vmatmul.f32.vlgmr.msra.gmra.mxu3 %v1912_v50  ;;  %v395_v20 = vld [vmem:[%s2878_s3 + $0x718] sm:$0xff] }
 0x185   :  { %620 = vmatmul.f32.vlgmr.msra.gmra.mxu1 %v1906_v48  ;;  %680 = vmatmul.f32.vlgmr.msrb.gmra.mxu0 %v1914_v51  ;;  %v199_v21 = vld [vmem:[%s2878_s3 + $0xf8] sm:$0xff] }
 0x186   :  { %684 = vmatpush.msrb.mxu1 %v231_v54  ;;  %704 = vmatpush.msrb.mxu2 %v295_v55  ;;  %v263_v23 = vld [vmem:[%s2878_s3 + $0x2f8] sm:$0xff] }
 0x187   :  { %724 = vmatpush.msrb.mxu3 %v359_v56  ;;  %744 = vmatpush.msra.mxu0 %v423_v57  ;;  %v327_v24 = vld [vmem:[%s2878_s3 + $0x4f8] sm:$0xff] }
 0x188   :  { %685 = vmatpush.msrb.mxu1 %v227_v58  ;;  %705 = vmatpush.msrb.mxu2 %v291_v59  ;;  %v391_v26 = vld [vmem:[%s2878_s3 + $0x6f8] sm:$0xff]  ;;  %v424_v58 = vld [vmem:[%s2880_s4] sm:$0xf] }
 0x189   :  { %725 = vmatpush.msrb.mxu3 %v355_v60  ;;  %745 = vmatpush.msra.mxu0 %v419_v61  ;;  %v195_v27 = vld [vmem:[%s2878_s3 + $0xd8] sm:$0xff]  ;;  %v426_v59 = vperm.slane %v424_v58, 0 }
 0x18a   :  { %686 = vmatpush.msrb.mxu1 %v223_v62  ;;  %706 = vmatpush.msrb.mxu2 %v287_v63  ;;  %v259_v28 = vld [vmem:[%s2878_s3 + $0x2d8] sm:$0xff] }
 0x18b   :  { %726 = vmatpush.msrb.mxu3 %v351_v0  ;;  %746 = vmatpush.msra.mxu0 %v415_v1  ;;  %v323_v29 = vld [vmem:[%s2878_s3 + $0x4d8] sm:$0xff] }
 0x18c   :  { %687 = vmatpush.msrb.mxu1 %v219_v2  ;;  %707 = vmatpush.msrb.mxu2 %v283_v3  ;;  %v387_v30 = vld [vmem:[%s2878_s3 + $0x6d8] sm:$0xff] }
 0x18d   :  { %727 = vmatpush.msrb.mxu3 %v347_v4  ;;  %747 = vmatpush.msra.mxu0 %v411_v5  ;;  %v191_v31 = vld [vmem:[%s2878_s3 + $0xb8] sm:$0xff] }
 0x18e   :  { %688 = vmatpush.msrb.mxu1 %v215_v6  ;;  %708 = vmatpush.msrb.mxu2 %v279_v7  ;;  %v255_v32 = vld [vmem:[%s2878_s3 + $0x2b8] sm:$0xff] }
 0x18f   :  { %728 = vmatpush.msrb.mxu3 %v343_v8  ;;  %748 = vmatpush.msra.mxu0 %v407_v9  ;;  %v319_v33 = vld [vmem:[%s2878_s3 + $0x4b8] sm:$0xff] }
 0x190   :  { %689 = vmatpush.msrb.mxu1 %v211_v10  ;;  %709 = vmatpush.msrb.mxu2 %v275_v11  ;;  %v383_v34 = vld [vmem:[%s2878_s3 + $0x6b8] sm:$0xff] }
 0x191   :  { %729 = vmatpush.msrb.mxu3 %v339_v12  ;;  %749 = vmatpush.msra.mxu0 %v403_v13  ;;  %v187_v35 = vld [vmem:[%s2878_s3 + $0x98] sm:$0xff] }
 0x192   :  { %690 = vmatpush.msrb.mxu1 %v207_v14  ;;  %710 = vmatpush.msrb.mxu2 %v271_v15  ;;  %v251_v36 = vld [vmem:[%s2878_s3 + $0x298] sm:$0xff]  ;;  %v428_v14 = vperm.slane %v424_v58, 2 }
 0x193   :  { %730 = vmatpush.msrb.mxu3 %v335_v16  ;;  %750 = vmatpush.msra.mxu0 %v399_v22  ;;  %v315_v37 = vld [vmem:[%s2878_s3 + $0x498] sm:$0xff] }
 0x194   :  { %691 = vmatpush.msrb.mxu1 %v203_v17  ;;  %711 = vmatpush.msrb.mxu2 %v267_v18  ;;  %v379_v38 = vld [vmem:[%s2878_s3 + $0x698] sm:$0xff] }
 0x195   :  { %731 = vmatpush.msrb.mxu3 %v331_v19  ;;  %751 = vmatpush.msra.mxu0 %v395_v20  ;;  %v183_v39 = vld [vmem:[%s2878_s3 + $0x78] sm:$0xff] }
 0x196   :  { %692 = vmatpush.msrb.mxu1 %v199_v21  ;;  %712 = vmatpush.msrb.mxu2 %v263_v23  ;;  %v247_v40 = vld [vmem:[%s2878_s3 + $0x278] sm:$0xff] }
 0x197   :  { %732 = vmatpush.msrb.mxu3 %v327_v24  ;;  %752 = vmatpush.msra.mxu0 %v391_v26  ;;  %v311_v41 = vld [vmem:[%s2878_s3 + $0x478] sm:$0xff] }
 0x198   :  { %693 = vmatpush.msrb.mxu1 %v195_v27  ;;  %713 = vmatpush.msrb.mxu2 %v259_v28  ;;  %v375_v42 = vld [vmem:[%s2878_s3 + $0x678] sm:$0xff] }
 0x199   :  { %733 = vmatpush.msrb.mxu3 %v323_v29  ;;  %753 = vmatpush.msra.mxu0 %v387_v30  ;;  %v179_v43 = vld [vmem:[%s2878_s3 + $0x58] sm:$0xff]  ;;  %v896_v30 = vld [vmem:[%s2881_s6 + $0x2d0] sm:$0xff] }
 0x19a   :  { %694 = vmatpush.msrb.mxu1 %v191_v31  ;;  %714 = vmatpush.msrb.mxu2 %v255_v32  ;;  %v243_v44 = vld [vmem:[%s2878_s3 + $0x258] sm:$0xff]  ;;  %v890_v31 = vld [vmem:[%s2881_s6 + $0x2a0] sm:$0xff]  ;;  %v429_v32 = vperm.slane %v424_v58, 3 }
 0x19b   :  { %734 = vmatpush.msrb.mxu3 %v319_v33  ;;  %754 = vmatpush.msra.mxu0 %v383_v34  ;;  %v307_v25 = vld [vmem:[%s2878_s3 + $0x458] sm:$0xff] }
 0x19c   :  { %695 = vmatpush.msrb.mxu1 %v187_v35  ;;  %715 = vmatpush.msrb.mxu2 %v251_v36  ;;  %v371_v45 = vld [vmem:[%s2878_s3 + $0x658] sm:$0xff] }
 0x19d   :  { %735 = vmatpush.msrb.mxu3 %v315_v37  ;;  %755 = vmatpush.msra.mxu0 %v379_v38  ;;  %v175_v46 = vld [vmem:[%s2878_s3 + $0x38] sm:$0xff] }
 0x19e   :  { %696 = vmatpush.msrb.mxu1 %v183_v39  ;;  %716 = vmatpush.msrb.mxu2 %v247_v40  ;;  %v239_v47 = vld [vmem:[%s2878_s3 + $0x238] sm:$0xff] }
 0x19f   :  { %736 = vmatpush.msrb.mxu3 %v311_v41  ;;  %756 = vmatpush.msra.mxu0 %v375_v42  ;;  %v303_v52 = vld [vmem:[%s2878_s3 + $0x438] sm:$0xff] }
 0x1a0   :  { %697 = vmatpush.msrb.mxu1 %v179_v43  ;;  %717 = vmatpush.msrb.mxu2 %v243_v44  ;;  %v367_v53 = vld [vmem:[%s2878_s3 + $0x638] sm:$0xff]  ;;  %v884_v44 = vld [vmem:[%s2881_s6 + $0x270] sm:$0xff] }
 0x1a1   :  { %737 = vmatpush.msrb.mxu3 %v307_v25  ;;  %757 = vmatpush.msra.mxu0 %v371_v45  ;;  %v171_v54 = vld [vmem:[%s2878_s3 + $0x18] sm:$0xff]  ;;  %v878_v25 = vld [vmem:[%s2881_s6 + $0x240] sm:$0xff] }
 0x1a2   :  { %v235_v55 = vld [vmem:[%s2878_s3 + $0x218] sm:$0xff]  ;;  %698 = vmatpush.msrb.mxu1 %v175_v46  ;;  %718 = vmatpush.msrb.mxu2 %v239_v47  ;;  %v872_v46 = vld [vmem:[%s2881_s6 + $0x210] sm:$0xff] }
 0x1a3   :  { %v299_v56 = vld [vmem:[%s2878_s3 + $0x418] sm:$0xff]  ;;  %738 = vmatpush.msrb.mxu3 %v303_v52  ;;  %758 = vmatpush.msra.mxu0 %v367_v53  ;;  %v891_v52 = vld [vmem:[%s2881_s6 + $0x2a8] sm:$0xff]  ;;  %v866_v53 = vld [vmem:[%s2881_s6 + $0x1e0] sm:$0xff] }
 0x1a4   :  { %v363_v57 = vld [vmem:[%s2878_s3 + $0x618] sm:$0xff]  ;;  %699 = vmatpush.msrb.mxu1 %v171_v54  ;;  %719 = vmatpush.msrb.mxu2 %v235_v55  ;;  %s1409_s3 = smov 56   ;;  %v860_v55 = vld [vmem:[%s2881_s6 + $0x1b0] sm:$0xff] }
 0x1a5   :  { %739 = vmatpush.msrb.mxu3 %v299_v56  ;;  %759 = vmatpush.msra.mxu0 %v363_v57  ;;  %v897_v47 = vld [vmem:[%s2881_s6 + $0x2d8] sm:$0xff]  ;;  %v879_v56 = vld [vmem:[%s2881_s6 + $0x248] sm:$0xff]  ;;  %v854_v57 = vld [vmem:[%s2881_s6 + $0x180] sm:$0xff] }
 0x1a6   :  { %700 = vmatmul.f32.vlgmr.msrb.gmra.mxu1 %v1906_v48  ;;  %720 = vmatmul.f32.vlgmr.msrb.gmra.mxu2 %v1908_v49  ;;  %v427_v48 = vperm.slane %v424_v58, 1  ;;  %v885_v54 = vld [vmem:[%s2881_s6 + $0x278] sm:$0xff] }
 0x1a7   :  { %740 = vmatmul.f32.vlgmr.msrb.gmra.mxu3 %v1912_v50  ;;  %760 = vmatmul.f32.vlgmr.msra.gmra.mxu0 %v1914_v51  ;;  %v873_v58 = vld [vmem:[%s2881_s6 + $0x218] sm:$0xff] }
 0x1a8   :  { %973 = vmatpush.msra.mxu1 %v896_v30  ;;  %1013 = vmatpush.msra.mxu3 %v897_v47  ;;  %v857_v30 = vld [vmem:[%s2881_s6 + $0x198] sm:$0xff] }
 0x1a9   :  { %v917_v47 = vld [vmem:[%s2881_s6 + $0x378] sm:$0xff] }
 0x1aa   :  { %974 = vmatpush.msra.mxu1 %v890_v31  ;;  %1014 = vmatpush.msra.mxu3 %v891_v52  ;;  %v851_v31 = vld [vmem:[%s2881_s6 + $0x168] sm:$0xff]  ;;  %v886_v52 = vld [vmem:[%s2881_s6 + $0x280] sm:$0xff] }
 0x1ac   :  { %975 = vmatpush.msra.mxu1 %v884_v44  ;;  %1015 = vmatpush.msra.mxu3 %v885_v54  ;;  %v923_v44 = vld [vmem:[%s2881_s6 + $0x3a8] sm:$0xff] }
 0x1ad   :  { %v815_v54 = vld [vmem:[%s2881_s6 + $0x48] sm:$0xff] }
 0x1ae   :  { %976 = vmatpush.msra.mxu1 %v878_v25  ;;  %1016 = vmatpush.msra.mxu3 %v879_v56  ;;  %v892_v25 = vld [vmem:[%s2881_s6 + $0x2b0] sm:$0xff] }
 0x1af   :  { %v880_v56 = vld [vmem:[%s2881_s6 + $0x250] sm:$0xff] }
 0x1b0   :  { %977 = vmatpush.msra.mxu1 %v872_v46  ;;  %1017 = vmatpush.msra.mxu3 %v873_v58  ;;  %v821_v46 = vld [vmem:[%s2881_s6 + $0x78] sm:$0xff] }
 0x1b1   :  { %v809_v58 = vld [vmem:[%s2881_s6 + $0x18] sm:$0xff] }
 0x1b2   :  { %978 = vmatpush.msra.mxu1 %v866_v53  ;;  %v927_v53 = vld [vmem:[%s2881_s6 + $0x3c8] sm:$0xff] }
 0x1b4   :  { %979 = vmatpush.msra.mxu1 %v860_v55  ;;  %v911_v55 = vld [vmem:[%s2881_s6 + $0x348] sm:$0xff] }
 0x1b6   :  { %980 = vmatpush.msra.mxu1 %v854_v57  ;;  %v921_v57 = vld [vmem:[%s2881_s6 + $0x398] sm:$0xff] }
 0x1dc   :  { %v461_v60 = vpop.f32.mrf.mxu1 }
 0x1dd   :  { %v462_v61 = vadd.f32 %v461_v60, %v426_v59  ;;  %v521_v2 = vpop.f32.mrf.mxu0  ;;  %v950_v59 = vld [vmem:[%s2881_s6 + $0x480] sm:$0xff]  ;;  %v848_v60 = vld [vmem:[%s2881_s6 + $0x150] sm:$0xff] }
 0x1de   :  { %v779_v12 = vpop.permute.xlu0 %778  ;;  %v781_v26 = vpop.permute.xlu1 %780  ;;  %1000 = vmatpush.msra.mxu2 %v950_v59  ;;  %981 = vmatpush.msra.mxu1 %v848_v60  ;;  %v905_v59 = vld [vmem:[%s2881_s6 + $0x318] sm:$0xff]  ;;  %v874_v60 = vld [vmem:[%s2881_s6 + $0x220] sm:$0xff] }
 0x1df   :  { %v783_v28 = vsel %vm782_vm4, %v779_v12, %v781_v26 }
 0x1e2   :  { %v481_v62 = vpop.f32.mrf.mxu2 }
 0x1e3   :  { %v482_v63 = vadd.f32 %v481_v62, %v462_v61  ;;  %v501_v0 = vpop.f32.mrf.mxu3  ;;  %v944_v61 = vld [vmem:[%s2881_s6 + $0x450] sm:$0xff]  ;;  %v867_v62 = vld [vmem:[%s2881_s6 + $0x1e8] sm:$0xff] }
 0x1e4   :  { %1001 = vmatpush.msra.mxu2 %v944_v61  ;;  %1018 = vmatpush.msra.mxu3 %v867_v62  ;;  %v915_v61 = vld [vmem:[%s2881_s6 + $0x368] sm:$0xff]  ;;  %v868_v62 = vld [vmem:[%s2881_s6 + $0x1f0] sm:$0xff] }
 0x1e5   :  { %v502_v1 = vadd.f32 %v501_v0, %v482_v63  ;;  %v938_v63 = vld [vmem:[%s2881_s6 + $0x420] sm:$0xff] }
 0x1e6   :  { %v842_v0 = vld [vmem:[%s2881_s6 + $0x120] sm:$0xff]  ;;  %1002 = vmatpush.msra.mxu2 %v938_v63  ;;  %v909_v63 = vld [vmem:[%s2881_s6 + $0x338] sm:$0xff] }
 0x1e7   :  { %v2305_v3 = vadd.f32 %v521_v2, %v502_v1  ;;  %v601_v7 = vpop.f32.mrf.mxu0  ;;  %v861_v1 = vld [vmem:[%s2881_s6 + $0x1b8] sm:$0xff]  ;;  %v932_v2 = vld [vmem:[%s2881_s6 + $0x3f0] sm:$0xff]  ;;  %982 = vmatpush.msra.mxu1 %v842_v0  ;;  %v862_v0 = vld [vmem:[%s2881_s6 + $0x1c0] sm:$0xff] }
 0x1e8   :  { %1019 = vmatpush.msra.mxu3 %v861_v1  ;;  %1003 = vmatpush.msra.mxu2 %v932_v2  ;;  %v903_v1 = vld [vmem:[%s2881_s6 + $0x308] sm:$0xff]  ;;  %v952_v2 = vld [vmem:[%s2881_s6 + $0x490] sm:$0xff] }
 0x1ea   :  { %v541_v49 = vpop.f32.mrf.mxu1 }
 0x1eb   :  { %v542_v4 = vadd.f32 %v541_v49, %v427_v48  ;;  %v836_v48 = vld [vmem:[%s2881_s6 + $0xf0] sm:$0xff]  ;;  %v855_v49 = vld [vmem:[%s2881_s6 + $0x188] sm:$0xff] }
 0x1ec   :  { %v561_v50 = vpop.f32.mrf.mxu2  ;;  %v581_v51 = vpop.f32.mrf.mxu3  ;;  %983 = vmatpush.msra.mxu1 %v836_v48  ;;  %1020 = vmatpush.msra.mxu3 %v855_v49  ;;  %v856_v48 = vld [vmem:[%s2881_s6 + $0x190] sm:$0xff]  ;;  %v946_v49 = vld [vmem:[%s2881_s6 + $0x460] sm:$0xff] }
 0x1ed   :  { %v562_v5 = vadd.f32 %v561_v50, %v542_v4  ;;  %v926_v4 = vld [vmem:[%s2881_s6 + $0x3c0] sm:$0xff] }
 0x1ee   :  { %v830_v50 = vld [vmem:[%s2881_s6 + $0xc0] sm:$0xff]  ;;  %1004 = vmatpush.msra.mxu2 %v926_v4 }
 0x1ef   :  { %v582_v6 = vadd.f32 %v581_v51, %v562_v5  ;;  %v849_v5 = vld [vmem:[%s2881_s6 + $0x158] sm:$0xff]  ;;  %v920_v51 = vld [vmem:[%s2881_s6 + $0x390] sm:$0xff]  ;;  %984 = vmatpush.msra.mxu1 %v830_v50  ;;  %v850_v4 = vld [vmem:[%s2881_s6 + $0x160] sm:$0xff] }
 0x1f0   :  { %1021 = vmatpush.msra.mxu3 %v849_v5  ;;  %1005 = vmatpush.msra.mxu2 %v920_v51  ;;  %v940_v50 = vld [vmem:[%s2881_s6 + $0x430] sm:$0xff]  ;;  %v934_v51 = vld [vmem:[%s2881_s6 + $0x400] sm:$0xff] }
 0x1f1   :  { %v2307_v8 = vadd.f32 %v601_v7, %v582_v6  ;;  %v824_v6 = vld [vmem:[%s2881_s6 + $0x90] sm:$0xff]  ;;  %v843_v7 = vld [vmem:[%s2881_s6 + $0x128] sm:$0xff] }
 0x1f2   :  { %985 = vmatpush.msra.mxu1 %v824_v6  ;;  %1022 = vmatpush.msra.mxu3 %v843_v7  ;;  %v844_v5 = vld [vmem:[%s2881_s6 + $0x130] sm:$0xff]  ;;  %v838_v6 = vld [vmem:[%s2881_s6 + $0x100] sm:$0xff] }
 0x1f3   :  { %v764_v9 = vmul.f32 0.5, %v2307_v8  ;;  %v928_v7 = vld [vmem:[%s2881_s6 + $0x3d0] sm:$0xff] }
 0x1f5   :  { %v767_v10 = vmul.f32 1.442695, %v764_v9  ;;  %v914_v9 = vld [vmem:[%s2881_s6 + $0x360] sm:$0xff] }
 0x1f6   :  { %1006 = vmatpush.msra.mxu2 %v914_v9  ;;  %v832_v9 = vld [vmem:[%s2881_s6 + $0xd0] sm:$0xff] }
 0x1f7   :  { %1376 = vpow2.f32 %v767_v10  ;;  %v818_v10 = vld [vmem:[%s2881_s6 + $0x60] sm:$0xff] }
 0x1f8   :  { %986 = vmatpush.msra.mxu1 %v818_v10  ;;  %v922_v10 = vld [vmem:[%s2881_s6 + $0x3a0] sm:$0xff] }
 0x1fd   :  { %v1377_v11 = vpop.eup %1376 }
 0x1fe   :  { %v787_v13 = vmul.f32 %v1377_v11, %v779_v12  ;;  %v837_v11 = vld [vmem:[%s2881_s6 + $0xf8] sm:$0xff]  ;;  %v812_v12 = vld [vmem:[%s2881_s6 + $0x30] sm:$0xff] }
 0x1ff   :  { %1023 = vmatpush.msra.mxu3 %v837_v11  ;;  %987 = vmatpush.msra.mxu1 %v812_v12  ;;  %v826_v11 = vld [vmem:[%s2881_s6 + $0xa0] sm:$0xff]  ;;  %v916_v12 = vld [vmem:[%s2881_s6 + $0x370] sm:$0xff] }
 0x200   :  { %793 = vrot.lane.b32.xlu2 %v787_v13, %s1409_s3  ;;  %v831_v13 = vld [vmem:[%s2881_s6 + $0xc8] sm:$0xff] }
 0x201   :  { %1024 = vmatpush.msra.mxu3 %v831_v13  ;;  %v820_v13 = vld [vmem:[%s2881_s6 + $0x70] sm:$0xff] }
 0x202   :  { %v621_v15 = vpop.f32.mrf.mxu1  ;;  %v681_v20 = vpop.f32.mrf.mxu0 }
 0x203   :  { %v622_v16 = vadd.f32 %v621_v15, %v428_v14  ;;  %v806_v14 = vld [vmem:[%s2881_s6] sm:$0xff]  ;;  %v899_v15 = vld [vmem:[%s2881_s6 + $0x2e8] sm:$0xff] }
 0x204   :  { %988 = vmatpush.msra.mxu1 %v806_v14 }
 0x206   :  { %v641_v22 = vpop.f32.mrf.mxu2  ;;  %1093 = vmatpush.msrb.mxu1 %v899_v15 }
 0x207   :  { %v642_v17 = vadd.f32 %v641_v22, %v622_v16  ;;  %v661_v18 = vpop.f32.mrf.mxu3  ;;  %v825_v16 = vld [vmem:[%s2881_s6 + $0x98] sm:$0xff] }
 0x208   :  { %v893_v22 = vld [vmem:[%s2881_s6 + $0x2b8] sm:$0xff]  ;;  %1025 = vmatpush.msra.mxu3 %v825_v16 }
 0x209   :  { %v662_v19 = vadd.f32 %v661_v18, %v642_v17  ;;  %v819_v17 = vld [vmem:[%s2881_s6 + $0x68] sm:$0xff]  ;;  %1094 = vmatpush.msrb.mxu1 %v893_v22 }
 0x20a   :  { %v887_v18 = vld [vmem:[%s2881_s6 + $0x288] sm:$0xff]  ;;  %1026 = vmatpush.msra.mxu3 %v819_v17  ;;  %v901_v17 = vld [vmem:[%s2881_s6 + $0x2f8] sm:$0xff] }
 0x20b   :  { %v682_v21 = vadd.f32 %v681_v20, %v662_v19  ;;  %v813_v19 = vld [vmem:[%s2881_s6 + $0x38] sm:$0xff]  ;;  %1095 = vmatpush.msrb.mxu1 %v887_v18  ;;  %v955_v18 = vld [vmem:[%s2881_s6 + $0x4a8] sm:$0xff] }
 0x20c   :  { %v881_v20 = vld [vmem:[%s2881_s6 + $0x258] sm:$0xff]  ;;  %1027 = vmatpush.msra.mxu3 %v813_v19  ;;  %v895_v19 = vld [vmem:[%s2881_s6 + $0x2c8] sm:$0xff] }
 0x20d   :  { %v765_v23 = vmul.f32 0.5, %v682_v21  ;;  %v807_v21 = vld [vmem:[%s2881_s6 + $0x8] sm:$0xff]  ;;  %1096 = vmatpush.msrb.mxu1 %v881_v20  ;;  %v814_v20 = vld [vmem:[%s2881_s6 + $0x40] sm:$0xff] }
 0x20e   :  { %1028 = vmatpush.msra.mxu3 %v807_v21  ;;  %v910_v21 = vld [vmem:[%s2881_s6 + $0x340] sm:$0xff] }
 0x20f   :  { %v769_v24 = vmul.f32 1.442695, %v765_v23  ;;  %v953_v23 = vld [vmem:[%s2881_s6 + $0x498] sm:$0xff] }
 0x210   :  { %1120 = vmatpush.msrb.mxu3 %v953_v23  ;;  %v808_v23 = vld [vmem:[%s2881_s6 + $0x10] sm:$0xff] }
 0x211   :  { %1378 = vpow2.f32 %v769_v24  ;;  %v875_v24 = vld [vmem:[%s2881_s6 + $0x228] sm:$0xff] }
 0x212   :  { %1097 = vmatpush.msrb.mxu1 %v875_v24  ;;  %v904_v24 = vld [vmem:[%s2881_s6 + $0x310] sm:$0xff] }
 0x217   :  { %v1379_v27 = vpop.eup %1378 }
 0x218   :  { %v788_v29 = vmul.f32 %v1379_v27, %v783_v28  ;;  %v869_v27 = vld [vmem:[%s2881_s6 + $0x1f8] sm:$0xff] }
 0x219   :  { %v941_v28 = vld [vmem:[%s2881_s6 + $0x438] sm:$0xff]  ;;  %1098 = vmatpush.msrb.mxu1 %v869_v27  ;;  %v943_v27 = vld [vmem:[%s2881_s6 + $0x448] sm:$0xff] }
 0x21a   :  { %795 = vrot.lane.b32.xlu0 %v788_v29, %s1409_s3  ;;  %v863_v29 = vld [vmem:[%s2881_s6 + $0x1c8] sm:$0xff] }
 0x21b   :  { %1099 = vmatpush.msrb.mxu1 %v863_v29  ;;  %v937_v29 = vld [vmem:[%s2881_s6 + $0x418] sm:$0xff] }
 0x21d   :  { %1100 = vmatpush.msrb.mxu1 %v857_v30  ;;  %v877_v30 = vld [vmem:[%s2881_s6 + $0x238] sm:$0xff] }
 0x21f   :  { %1101 = vmatpush.msrb.mxu1 %v851_v31  ;;  %v931_v31 = vld [vmem:[%s2881_s6 + $0x3e8] sm:$0xff] }
 0x223   :  { %v701_v33 = vpop.f32.mrf.mxu1 }
 0x224   :  { %v702_v34 = vadd.f32 %v701_v33, %v429_v32  ;;  %v761_v39 = vpop.f32.mrf.mxu0  ;;  %v845_v32 = vld [vmem:[%s2881_s6 + $0x138] sm:$0xff]  ;;  %v908_v33 = vld [vmem:[%s2881_s6 + $0x330] sm:$0xff] }
 0x225   :  { %1102 = vmatpush.msrb.mxu1 %v845_v32  ;;  %1007 = vmatpush.msra.mxu2 %v908_v33  ;;  %v871_v32 = vld [vmem:[%s2881_s6 + $0x208] sm:$0xff]  ;;  %v925_v33 = vld [vmem:[%s2881_s6 + $0x3b8] sm:$0xff] }
 0x229   :  { %v721_v35 = vpop.f32.mrf.mxu2 }
 0x22a   :  { %v722_v36 = vadd.f32 %v721_v35, %v702_v34  ;;  %v741_v37 = vpop.f32.mrf.mxu3  ;;  %v951_v34 = vld [vmem:[%s2881_s6 + $0x488] sm:$0xff] }
 0x22b   :  { %v839_v35 = vld [vmem:[%s2881_s6 + $0x108] sm:$0xff]  ;;  %1040 = vmatpush.msrb.mxu0 %v951_v34  ;;  %v865_v34 = vld [vmem:[%s2881_s6 + $0x1d8] sm:$0xff] }
 0x22c   :  { %v742_v38 = vadd.f32 %v741_v37, %v722_v36  ;;  %v935_v36 = vld [vmem:[%s2881_s6 + $0x408] sm:$0xff]  ;;  %v902_v37 = vld [vmem:[%s2881_s6 + $0x300] sm:$0xff]  ;;  %1103 = vmatpush.msrb.mxu1 %v839_v35 }
 0x22d   :  { %1008 = vmatpush.msra.mxu2 %v902_v37  ;;  %v919_v35 = vld [vmem:[%s2881_s6 + $0x388] sm:$0xff]  ;;  %v913_v37 = vld [vmem:[%s2881_s6 + $0x358] sm:$0xff] }
 0x22e   :  { %v762_v40 = vadd.f32 %v761_v39, %v742_v38  ;;  %v945_v38 = vld [vmem:[%s2881_s6 + $0x458] sm:$0xff] }
 0x22f   :  { %v833_v39 = vld [vmem:[%s2881_s6 + $0xd8] sm:$0xff]  ;;  %1041 = vmatpush.msrb.mxu0 %v945_v38 }
 0x230   :  { %v766_v41 = vmul.f32 0.5, %v762_v40  ;;  %v929_v40 = vld [vmem:[%s2881_s6 + $0x3d8] sm:$0xff]  ;;  %1104 = vmatpush.msrb.mxu1 %v833_v39  ;;  %v907_v39 = vld [vmem:[%s2881_s6 + $0x328] sm:$0xff] }
 0x231   :  { %v853_v38 = vld [vmem:[%s2881_s6 + $0x178] sm:$0xff] }
 0x232   :  { %v771_v42 = vmul.f32 1.442695, %v766_v41  ;;  %v898_v41 = vld [vmem:[%s2881_s6 + $0x2e0] sm:$0xff] }
 0x233   :  { %1053 = vmatpush.msrb.mxu2 %v898_v41  ;;  %v841_v41 = vld [vmem:[%s2881_s6 + $0x118] sm:$0xff] }
 0x234   :  { %1380 = vpow2.f32 %v771_v42  ;;  %v939_v42 = vld [vmem:[%s2881_s6 + $0x428] sm:$0xff] }
 0x235   :  { %1042 = vmatpush.msrb.mxu0 %v939_v42  ;;  %1054 = vmatpush.msrb.mxu2 %v892_v25  ;;  %v835_v42 = vld [vmem:[%s2881_s6 + $0xe8] sm:$0xff]  ;;  %v817_v25 = vld [vmem:[%s2881_s6 + $0x58] sm:$0xff] }
 0x237   :  { %1055 = vmatpush.msrb.mxu2 %v886_v52 }
 0x239   :  { %1056 = vmatpush.msrb.mxu2 %v880_v56  ;;  %v888_v56 = vld [vmem:[%s2881_s6 + $0x290] sm:$0xff] }
 0x23a   :  { %v1381_v43 = vpop.eup %1380 }
 0x23b   :  { %v789_v45 = vmul.f32 %v1381_v43, %v781_v26  ;;  %v947_v26 = vld [vmem:[%s2881_s6 + $0x468] sm:$0xff]  ;;  %1057 = vmatpush.msrb.mxu2 %v874_v60  ;;  %v876_v60 = vld [vmem:[%s2881_s6 + $0x230] sm:$0xff] }
 0x23c   :  { %1121 = vmatpush.msrb.mxu3 %v947_v26  ;;  %v827_v43 = vld [vmem:[%s2881_s6 + $0xa8] sm:$0xff]  ;;  %v889_v26 = vld [vmem:[%s2881_s6 + $0x298] sm:$0xff] }
 0x23d   :  { %797 = vrot.lane.b32.xlu1 %v789_v45, %s1409_s3  ;;  %v933_v45 = vld [vmem:[%s2881_s6 + $0x3f8] sm:$0xff]  ;;  %1105 = vmatpush.msrb.mxu1 %v827_v43 }
 0x23e   :  { %1122 = vmatpush.msrb.mxu3 %v941_v28  ;;  %1043 = vmatpush.msrb.mxu0 %v933_v45  ;;  %v883_v28 = vld [vmem:[%s2881_s6 + $0x268] sm:$0xff]  ;;  %v829_v43 = vld [vmem:[%s2881_s6 + $0xb8] sm:$0xff] }
 0x23f   :  { %1106 = vmatpush.msrb.mxu1 %v821_v46  ;;  %1058 = vmatpush.msrb.mxu2 %v868_v62  ;;  %v811_v45 = vld [vmem:[%s2881_s6 + $0x28] sm:$0xff]  ;;  %v870_v62 = vld [vmem:[%s2881_s6 + $0x200] sm:$0xff] }
 0x240   :  { %1123 = vmatpush.msrb.mxu3 %v935_v36  ;;  %1044 = vmatpush.msrb.mxu0 %v927_v53  ;;  %v859_v36 = vld [vmem:[%s2881_s6 + $0x1a8] sm:$0xff]  ;;  %v900_v53 = vld [vmem:[%s2881_s6 + $0x2f0] sm:$0xff] }
 0x241   :  { %1107 = vmatpush.msrb.mxu1 %v815_v54  ;;  %1059 = vmatpush.msrb.mxu2 %v862_v0  ;;  %v954_v54 = vld [vmem:[%s2881_s6 + $0x4a0] sm:$0xff]  ;;  %v864_v0 = vld [vmem:[%s2881_s6 + $0x1d0] sm:$0xff] }
 0x242   :  { %1124 = vmatpush.msrb.mxu3 %v929_v40  ;;  %1045 = vmatpush.msrb.mxu0 %v921_v57  ;;  %v847_v40 = vld [vmem:[%s2881_s6 + $0x148] sm:$0xff]  ;;  %v942_v57 = vld [vmem:[%s2881_s6 + $0x440] sm:$0xff] }
 0x243   :  { %1108 = vmatpush.msrb.mxu1 %v809_v58  ;;  %1060 = vmatpush.msrb.mxu2 %v856_v48  ;;  %v882_v58 = vld [vmem:[%s2881_s6 + $0x260] sm:$0xff]  ;;  %v912_v48 = vld [vmem:[%s2881_s6 + $0x350] sm:$0xff] }
 0x244   :  { %1125 = vmatpush.msrb.mxu3 %v923_v44  ;;  %1046 = vmatpush.msrb.mxu0 %v915_v61  ;;  %v823_v44 = vld [vmem:[%s2881_s6 + $0x88] sm:$0xff]  ;;  %v930_v61 = vld [vmem:[%s2881_s6 + $0x3e0] sm:$0xff] }
 0x245   :  { %1061 = vmatpush.msrb.mxu2 %v850_v4  ;;  %v906_v4 = vld [vmem:[%s2881_s6 + $0x320] sm:$0xff] }
 0x246   :  { %1126 = vmatpush.msrb.mxu3 %v917_v47  ;;  %1047 = vmatpush.msrb.mxu0 %v909_v63  ;;  %v924_v63 = vld [vmem:[%s2881_s6 + $0x3b0] sm:$0xff] }
 0x247   :  { %1062 = vmatpush.msrb.mxu2 %v844_v5  ;;  %v840_v5 = vld [vmem:[%s2881_s6 + $0x110] sm:$0xff] }
 0x248   :  { %1127 = vmatpush.msrb.mxu3 %v911_v55  ;;  %1048 = vmatpush.msrb.mxu0 %v903_v1  ;;  %v894_v55 = vld [vmem:[%s2881_s6 + $0x2c0] sm:$0xff] }
 0x249   :  { %1063 = vmatpush.msrb.mxu2 %v838_v6  ;;  %v918_v1 = vld [vmem:[%s2881_s6 + $0x380] sm:$0xff]  ;;  %v828_v6 = vld [vmem:[%s2881_s6 + $0xb0] sm:$0xff] }
 0x24a   :  { %1128 = vmatpush.msrb.mxu3 %v905_v59  ;;  %1080 = vmatpush.msra.mxu0 %v952_v2  ;;  %v936_v59 = vld [vmem:[%s2881_s6 + $0x410] sm:$0xff]  ;;  %v858_v2 = vld [vmem:[%s2881_s6 + $0x1a0] sm:$0xff] }
 0x24b   :  { %1064 = vmatpush.msrb.mxu2 %v832_v9  ;;  %v816_v9 = vld [vmem:[%s2881_s6 + $0x50] sm:$0xff] }
 0x24c   :  { %1081 = vmatpush.msra.mxu0 %v946_v49  ;;  %v852_v49 = vld [vmem:[%s2881_s6 + $0x170] sm:$0xff] }
 0x24d   :  { %1065 = vmatpush.msrb.mxu2 %v826_v11 }
 0x24e   :  { %1082 = vmatpush.msra.mxu0 %v940_v50  ;;  %v846_v50 = vld [vmem:[%s2881_s6 + $0x140] sm:$0xff] }
 0x24f   :  { %1066 = vmatpush.msrb.mxu2 %v820_v13 }
 0x250   :  { %1083 = vmatpush.msra.mxu0 %v934_v51  ;;  %v834_v51 = vld [vmem:[%s2881_s6 + $0xe0] sm:$0xff] }
 0x251   :  { %1067 = vmatpush.msrb.mxu2 %v814_v20 }
 0x252   :  { %1084 = vmatpush.msra.mxu0 %v928_v7  ;;  %v822_v7 = vld [vmem:[%s2881_s6 + $0x80] sm:$0xff] }
 0x253   :  { %1068 = vmatpush.msrb.mxu2 %v808_v23 }
 0x254   :  { %1085 = vmatpush.msra.mxu0 %v922_v10  ;;  %v810_v10 = vld [vmem:[%s2881_s6 + $0x20] sm:$0xff] }
 0x256   :  { %1086 = vmatpush.msra.mxu0 %v916_v12  ;;  %v956_v12 = vld [vmem:[%s2882_s7] sm:$0x3f] }
 0x257   :  { %v959_v13 = vperm.slane %v956_v12, 1 }
 0x258   :  { %1087 = vmatpush.msra.mxu0 %v910_v21 }
 0x25a   :  { %v794_v14 = vpop.permute.xlu2 %793  ;;  %1088 = vmatpush.msra.mxu0 %v904_v24 }
 0x28c   :  { %v2602_v15 = vpop.permute.xlu0 %795 }
 0x28d   :  { %v800_v16 = vsel %vm799_vm5, %v794_v14, %v2602_v15 }
 0x28e   :  { %v2607_v22 = vadd.f32 %v800_v16, %v2305_v3  ;;  %v949_v3 = vld [vmem:[%s2881_s6 + $0x478] sm:$0xff] }
 0x290   :  { %989 = vmatmul.f32.vlgmr.msra.gmra.mxu1 %v2607_v22  ;;  %1029 = vmatmul.f32.vlgmr.msra.gmra.mxu3 %v2607_v22 }
 0x291   :  { %1173 = vmatpush.msra.mxu3 %v901_v17  ;;  %1200 = vmatpush.msra.mxu1 %v955_v18  ;;  %v958_v17 = vperm.slane %v956_v12, 0 }
 0x293   :  { %1174 = vmatpush.msra.mxu3 %v895_v19  ;;  %1201 = vmatpush.msra.mxu1 %v949_v3  ;;  %v961_v19 = vperm.slane %v956_v12, 3 }
 0x295   :  { %1175 = vmatpush.msra.mxu3 %v889_v26  ;;  %1202 = vmatpush.msra.mxu1 %v943_v27 }
 0x297   :  { %1176 = vmatpush.msra.mxu3 %v883_v28  ;;  %1203 = vmatpush.msra.mxu1 %v937_v29 }
 0x298   :  { %1109 = vmatmul.f32.vlgmr.msrb.gmra.mxu1 %v2607_v22 }
 0x299   :  { %1177 = vmatpush.msra.mxu3 %v877_v30  ;;  %1204 = vmatpush.msra.mxu1 %v931_v31  ;;  %v960_v31 = vperm.slane %v956_v12, 2 }
 0x29b   :  { %1178 = vmatpush.msra.mxu3 %v871_v32  ;;  %1205 = vmatpush.msra.mxu1 %v925_v33  ;;  %v963_v32 = vperm.slane %v956_v12, 5 }
 0x29d   :  { %1179 = vmatpush.msra.mxu3 %v865_v34  ;;  %1206 = vmatpush.msra.mxu1 %v919_v35 }
 0x29f   :  { %1180 = vmatpush.msra.mxu3 %v859_v36  ;;  %1207 = vmatpush.msra.mxu1 %v913_v37 }
 0x2a1   :  { %1181 = vmatpush.msra.mxu3 %v853_v38  ;;  %1208 = vmatpush.msra.mxu1 %v907_v39 }
 0x2a3   :  { %1182 = vmatpush.msra.mxu3 %v847_v40 }
 0x2a5   :  { %1183 = vmatpush.msra.mxu3 %v841_v41 }
 0x2a7   :  { %1184 = vmatpush.msra.mxu3 %v835_v42 }
 0x2a9   :  { %1185 = vmatpush.msra.mxu3 %v829_v43 }
 0x2ab   :  { %1186 = vmatpush.msra.mxu3 %v823_v44 }
 0x2ad   :  { %1187 = vmatpush.msra.mxu3 %v817_v25 }
 0x2af   :  { %v798_v46 = vpop.permute.xlu1 %797  ;;  %1188 = vmatpush.msra.mxu3 %v811_v45 }
 0x2b0   :  { %v801_v47 = vsel %vm799_vm5, %v2602_v15, %v798_v46 }
 0x2b1   :  { %v805_v52 = vadd.f32 %v801_v47, %v2307_v8  ;;  %v948_v8 = vld [vmem:[%s2881_s6 + $0x470] sm:$0xff] }
 0x2b3   :  { %1359 = vmatmul.msk.f32.vlgmr.msra.gmra.mxu2 %vm782_vm4, %v805_v52  ;;  %1360 = vmatmul.msk.f32.vlgmr.msrb.gmra.mxu0 %vm782_vm4, %v805_v52 }
 0x2b4   :  { %1362 = vmatmul.msk.f32.vlgmr.msrb.gmra.mxu3 %vm782_vm4, %v805_v52  ;;  %1133 = vmatpush.msrb.mxu0 %v900_v53 }
 0x2b5   :  { %1160 = vmatpush.msra.mxu2 %v954_v54  ;;  %1364 = vmatmul.msk.f32.vlgmr.msra.gmra.mxu1 %vm782_vm4, %v805_v52 }
 0x2b6   :  { %1134 = vmatpush.msrb.mxu0 %v894_v55 }
 0x2b7   :  { %1161 = vmatpush.msra.mxu2 %v948_v8  ;;  %v962_v8 = vperm.slane %v956_v12, 4 }
 0x2b8   :  { %1135 = vmatpush.msrb.mxu0 %v888_v56 }
 0x2b9   :  { %1162 = vmatpush.msra.mxu2 %v942_v57 }
 0x2ba   :  { %1136 = vmatpush.msrb.mxu0 %v882_v58 }
 0x2bb   :  { %1163 = vmatpush.msra.mxu2 %v936_v59  ;;  %1361 = vmatmul.msk.f32.vlgmr.msra.gmra.mxu0 %vm782_vm4, %v805_v52 }
 0x2bc   :  { %1069 = vmatmul.f32.vlgmr.msrb.gmra.mxu2 %v2607_v22  ;;  %1137 = vmatpush.msrb.mxu0 %v876_v60 }
 0x2bd   :  { %1164 = vmatpush.msra.mxu2 %v930_v61  ;;  %1189 = vmatmul.f32.vlgmr.msra.gmra.mxu3 %v2607_v22 }
 0x2be   :  { %1138 = vmatpush.msrb.mxu0 %v870_v62 }
 0x2bf   :  { %1165 = vmatpush.msra.mxu2 %v924_v63 }
 0x2c0   :  { %1139 = vmatpush.msrb.mxu0 %v864_v0 }
 0x2c1   :  { %1166 = vmatpush.msra.mxu2 %v918_v1 }
 0x2c2   :  { %1140 = vmatpush.msrb.mxu0 %v858_v2 }
 0x2c3   :  { %1167 = vmatpush.msra.mxu2 %v912_v48 }
 0x2c4   :  { %1141 = vmatpush.msrb.mxu0 %v852_v49 }
 0x2c5   :  { %1168 = vmatpush.msra.mxu2 %v906_v4 }
 0x2c6   :  { %1363 = vmatmul.msk.f32.vlgmr.msra.gmra.mxu2 %vm782_vm4, %v805_v52  ;;  %1142 = vmatpush.msrb.mxu0 %v846_v50 }
 0x2c8   :  { %1143 = vmatpush.msrb.mxu0 %v840_v5 }
 0x2ca   :  { %1144 = vmatpush.msrb.mxu0 %v834_v51 }
 0x2cc   :  { %1145 = vmatpush.msrb.mxu0 %v828_v6 }
 0x2ce   :  { %1146 = vmatpush.msrb.mxu0 %v822_v7 }
 0x2d0   :  { %1147 = vmatpush.msrb.mxu0 %v816_v9 }
 0x2d2   :  { %1148 = vmatpush.msrb.mxu0 %v810_v10 }
 0x2d3   :  { %1149 = vmatmul.f32.vlgmr.msrb.gmra.mxu0 %v2607_v22 }
 0x30d   :  { %v990_v11 = vpop.f32.mrf.mxu1 }
 0x30e   :  { %v991_v21 = vadd.f32 %v990_v11, %v958_v17 }
 0x313   :  { %v1030_v14 = vpop.f32.mrf.mxu3 }
 0x314   :  { %v1031_v15 = vadd.f32 %v1030_v14, %v959_v13 }
 0x315   :  { %v1110_v3 = vpop.f32.mrf.mxu1 }
 0x316   :  { %v1111_v23 = vadd.f32 %v1110_v3, %v961_v19 }
 0x330   :  { %v1050_v16 = vpop.f32.mrf.mxu0 }
 0x331   :  { %v1051_v18 = vadd.f32 %v1050_v16, %v1031_v15 }
 0x332   :  { %v1210_v40 = vpop.f32.mrf.mxu1 }
 0x333   :  { %v1366_v20 = vmul.f32 -1.442695, %v1051_v18 }
 0x335   :  { %1382 = vpow2.f32 %v1366_v20 }
 0x336   :  { %v1010_v24 = vpop.f32.mrf.mxu2 }
 0x337   :  { %v1011_v26 = vadd.f32 %v1010_v24, %v991_v21  ;;  %v1130_v22 = vpop.f32.mrf.mxu3 }
 0x338   :  { %v1131_v27 = vadd.f32 %v1130_v22, %v1111_v23  ;;  %v1090_v42 = vpop.f32.mrf.mxu0 }
 0x339   :  { %v1365_v28 = vmul.f32 -1.442695, %v1011_v26 }
 0x33a   :  { %v1368_v29 = vmul.f32 -1.442695, %v1131_v27 }
 0x33b   :  { %1384 = vpow2.f32 %v1365_v28  ;;  %v1383_v30 = vpop.eup %1382 }
 0x33c   :  { %1386 = vpow2.f32 %v1368_v29  ;;  %v2789_v33 = vadd.f32 1.0, %v1383_v30 }
 0x33e   :  { %1388 = vrcp.f32 %v2789_v33  ;;  %vm1257_vm6 = vweird.f32 %v2789_v33  ;;  %v1261_v50 = vand.u32 2147483647, %v2789_v33  ;;  %v1263_v7 = vand.u32 2147483648, %v2789_v33 }
 0x33f   :  { %v1070_v34 = vpop.f32.mrf.mxu2 }
 0x340   :  { %v1071_v35 = vadd.f32 %v1070_v34, %v960_v31  ;;  %v1190_v36 = vpop.f32.mrf.mxu3  ;;  %vm1262_vm0 = vcmp.eq.f32.partialorder %v1261_v50, 8.507059e+37  ;;  %v1264_v27 = vor.u32 1.1754944e-38, %v1263_v7 }
 0x341   :  { %v1385_v37 = vpop.eup %1384  ;;  %v1191_v38 = vadd.f32 %v1190_v36, %v963_v32 }
 0x342   :  { %v1387_v39 = vpop.eup %1386  ;;  %v2791_v41 = vadd.f32 1.0, %v1385_v37  ;;  %v1091_v44 = vadd.f32 %v1090_v42, %v1071_v35 }
 0x343   :  { %v2794_v43 = vadd.f32 1.0, %v1387_v39  ;;  %v1211_v25 = vadd.f32 %v1210_v40, %v1191_v38 }
 0x344   :  { %v1367_v45 = vmul.f32 -1.442695, %v1091_v44  ;;  %v2798_v47 = vpop.eup %1388  ;;  %vm1242_vm8 = vweird.f32 %v2791_v41  ;;  %v1248_v13 = vand.u32 2147483648, %v2791_v41  ;;  %v1246_v3 = vand.u32 2147483647, %v2791_v41 }
 0x345   :  { %1390 = vrcp.f32 %v2794_v43  ;;  %v1370_v46 = vmul.f32 -1.442695, %v1211_v25  ;;  %v1253_v54 = vmul.f32 %v2798_v47, %v2789_v33  ;;  %vm1258_vm7 = vweird.f32 %v2798_v47 }
 0x346   :  { %1392 = vrcp.f32 %v2791_v41  ;;  %vm1287_vm11 = vweird.f32 %v2794_v43  ;;  %v1293_v14 = vand.u32 2147483648, %v2794_v43  ;;  %vm2831_vm12 = vmor %vm1257_vm6, %vm1258_vm7  ;;  %v1291_v17 = vand.u32 2147483647, %v2794_v43 }
 0x347   :  { %1394 = vpow2.f32 %v1367_v45  ;;  %v1254_v59 = vsub.f32 1.0, %v1253_v54  ;;  %v1249_v29 = vor.u32 1.1754944e-38, %v1248_v13  ;;  %vm1247_vm5 = vcmp.eq.f32.partialorder %v1246_v3, 8.507059e+37 }
 0x348   :  { %1396 = vpow2.f32 %v1370_v46  ;;  %v1294_v30 = vor.u32 1.1754944e-38, %v1293_v14  ;;  %vm1292_vm2 = vcmp.eq.f32.partialorder %v1291_v17, 8.507059e+37  ;;  %vm1339_vm7 = vcmask 1045508  }
 0x349   :  { %v1255_v2 = vmul.f32 %v2798_v47, %v1254_v59  ;;  %v1170_v49 = vpop.f32.mrf.mxu2 }
 0x34b   :  { %v2800_v52 = vpop.eup %1390  ;;  %v1256_v6 = vadd.f32 %v2798_v47, %v1255_v2 }
 0x34c   :  { %v2802_v53 = vpop.eup %1392  ;;  %v1283_v55 = vmul.f32 %v2800_v52, %v2794_v43  ;;  %vm1288_vm9 = vweird.f32 %v2800_v52 }
 0x34d   :  { %v1395_v56 = vpop.eup %1394  ;;  %v1238_v57 = vmul.f32 %v2802_v53, %v2791_v41  ;;  %vm1243_vm13 = vweird.f32 %v2802_v53  ;;  %v1260_v19 = vsel %vm2831_vm12, %v2798_v47, %v1256_v6  ;;  %vm2842_vm14 = vmor %vm1287_vm11, %vm1288_vm9 }
 0x34e   :  { %v1397_v58 = vpop.eup %1396  ;;  %v1233_v60 = vadd.f32 1.0, %v1395_v56  ;;  %v1284_v62 = vsub.f32 1.0, %v1283_v55  ;;  %vm2853_vm1 = vmor %vm1242_vm8, %vm1243_vm13  ;;  %v1265_v34 = vsel %vm1262_vm0, %v1264_v27, %v1260_v19  ;;  %vm1341_vm8 = vcmask 1043456  }
 0x34f   :  { %v2810_v63 = vadd.f32 1.0, %v1397_v58  ;;  %v1239_v1 = vsub.f32 1.0, %v1238_v57  ;;  %v1333_v42 = vrot.slane %v1265_v34, 6 }
 0x350   :  { %v1150_v61 = vpop.f32.mrf.mxu0  ;;  %1398 = vrcp.f32 %v1233_v60  ;;  %v1285_v48 = vmul.f32 %v2800_v52, %v1284_v62  ;;  %v1278_v21 = vand.u32 2147483648, %v1233_v60  ;;  %v1276_v22 = vand.u32 2147483647, %v1233_v60 }
 0x351   :  { %v1151_v0 = vadd.f32 %v1150_v61, %v962_v8  ;;  %1400 = vrcp.f32 %v2810_v63  ;;  %v1240_v5 = vmul.f32 %v2802_v53, %v1239_v1  ;;  %vm1272_vm3 = vweird.f32 %v1233_v60 }
 0x352   :  { %v1286_v11 = vadd.f32 %v2800_v52, %v1285_v48  ;;  %v1279_v36 = vor.u32 1.1754944e-38, %v1278_v21  ;;  %vm1277_vm6 = vcmp.eq.f32.partialorder %v1276_v22, 8.507059e+37  ;;  %v1323_v54 = vand.u32 2147483648, %v2810_v63 }
 0x353   :  { %v1171_v4 = vadd.f32 %v1170_v49, %v1151_v0  ;;  %v1241_v16 = vadd.f32 %v2802_v53, %v1240_v5  ;;  %vm1317_vm11 = vweird.f32 %v2810_v63  ;;  %v1321_v55 = vand.u32 2147483647, %v2810_v63 }
 0x354   :  { %v1290_v24 = vsel %vm2842_vm14, %v2800_v52, %v1286_v11  ;;  %v1324_v58 = vor.u32 1.1754944e-38, %v1323_v54 }
 0x355   :  { %v1369_v9 = vmul.f32 -1.442695, %v1171_v4  ;;  %v1245_v31 = vsel %vm2853_vm1, %v2802_v53, %v1241_v16  ;;  %v1295_v35 = vsel %vm1292_vm2, %v1294_v30, %v1290_v24  ;;  %vm1322_vm13 = vcmp.eq.f32.partialorder %v1321_v55, 8.507059e+37 }
 0x356   :  { %v1399_v51 = vpop.eup %1398  ;;  %v1250_v40 = vsel %vm1247_vm5, %v1249_v29, %v1245_v31  ;;  %v1335_v43 = vrot.slane %v1295_v35, 2 }
 0x357   :  { %v2821_v10 = vpop.eup %1400  ;;  %v1268_v12 = vmul.f32 %v1399_v51, %v1233_v60  ;;  %1402 = vpow2.f32 %v1369_v9  ;;  %vm1273_vm15 = vweird.f32 %v1399_v51  ;;  %v1338_v45 = vsel %vm1337_vm10, %v1250_v40, %v1333_v42 }
 0x358   :  { %v1313_v23 = vmul.f32 %v2821_v10, %v2810_v63  ;;  %vm1274_vm4 = vmor %vm1272_vm3, %vm1273_vm15  ;;  %vm1318_vm9 = vweird.f32 %v2821_v10 }
 0x359   :  { %v1269_v18 = vsub.f32 1.0, %v1268_v12  ;;  %vm1319_vm12 = vmor %vm1317_vm11, %vm1318_vm9 }
 0x35a   :  { %v1314_v37 = vsub.f32 1.0, %v1313_v23 }
 0x35b   :  { %v1270_v26 = vmul.f32 %v1399_v51, %v1269_v18 }
 0x35c   :  { %v1315_v25 = vmul.f32 %v2821_v10, %v1314_v37 }
 0x35d   :  { %v1271_v32 = vadd.f32 %v1399_v51, %v1270_v26  ;;  %v1403_v33 = vpop.eup %1402 }
 0x35e   :  { %v1235_v39 = vadd.f32 1.0, %v1403_v33  ;;  %v1316_v52 = vadd.f32 %v2821_v10, %v1315_v25 }
 0x35f   :  { %v1275_v38 = vsel %vm1274_vm4, %v1399_v51, %v1271_v32 }
 0x360   :  { %v1280_v41 = vsel %vm1277_vm6, %v1279_v36, %v1275_v38  ;;  %1404 = vrcp.f32 %v1235_v39  ;;  %v1320_v56 = vsel %vm1319_vm12, %v2821_v10, %v1316_v52  ;;  %v1308_v59 = vand.u32 2147483648, %v1235_v39 }
 0x361   :  { %v1334_v44 = vrot.slane %v1280_v41, 4  ;;  %v1306_v61 = vand.u32 2147483647, %v1235_v39  ;;  %v1325_v62 = vsel %vm1322_vm13, %v1324_v58, %v1320_v56  ;;  %vm1302_vm15 = vweird.f32 %v1235_v39 }
 0x362   :  { %v1309_v1 = vor.u32 1.1754944e-38, %v1308_v59  ;;  %v1336_v2 = vrot.slane %v1325_v62, 6 }
 0x363   :  { %v1340_v46 = vsel %vm1339_vm7, %v1334_v44, %v1335_v43  ;;  %vm1307_vm1 = vcmp.eq.f32.partialorder %v1306_v61, 8.507059e+37 }
 0x364   :  { %v1342_v47 = vsel %vm1341_vm8, %v1338_v45, %v1340_v46 }
 0x365   :  { %1346 = vst [vmem:[%s2883_s8] sm:$0xff] %v1342_v47 }
 0x366   :  { %v1405_v53 = vpop.eup %1404 }
 0x367   :  { %v1298_v8 = vmul.f32 %v1405_v53, %v1235_v39  ;;  %vm1303_vm14 = vweird.f32 %v1405_v53 }
 0x368   :  { %vm1304_vm0 = vmor %vm1302_vm15, %vm1303_vm14 }
 0x369   :  { %v1299_v57 = vsub.f32 1.0, %v1298_v8 }
 0x36b   :  { %v1300_v60 = vmul.f32 %v1405_v53, %v1299_v57 }
 0x36d   :  { %v1301_v0 = vadd.f32 %v1405_v53, %v1300_v60 }
 0x36f   :  { %v1305_v48 = vsel %vm1304_vm0, %v1405_v53, %v1301_v0 }
 0x370   :  { %v1310_v63 = vsel %vm1307_vm1, %v1309_v1, %v1305_v48 }
 0x371   :  { %v1343_v49 = vsel %vm1337_vm10, %v1310_v63, %v1336_v2 }
 0x372   :  { %1347 = vst [vmem:[%s2883_s8 + $0x8] sm:$0xf] %v1343_v49 }

</bundles_post_ra>
